<compile_context>
chip_gen: v7x
topology: tpu7x:2x2x1
jax: 0.10.0
libtpu: 0.0.40
codegen_flags: <defaults>
</compile_context>

<pallas_src>
import functools

import jax
import jax.numpy as jnp
import numpy as np
from jax.experimental import pallas as pl
from jax.experimental.pallas import tpu as pltpu


def _round_up(v, m):
    return ((v + m - 1) // m) * m


def _pad_to(x, shape):
    pads = [(0, s - d) for d, s in zip(x.shape, shape)]
    return jnp.pad(x, pads)


# ----------------------------------------------------------------------------
# Pallas kernel
#   grid = (ensemble e, layer l, node-row-tile r)
#   per (e):     h_scr <- X[e]                         (at l == 0, r == 0)
#   per (e, l):  z_scr <- h_scr @ W[e, l]              (at r == 0)
#   per step:    out = relu(A[e, rows_r] @ z_scr + b)  -> xss, h_scr[rows_r]
#   final step:  h = P[e] @ h_scr; y = relu(h@Wl1+b)@Wl2+b
# ----------------------------------------------------------------------------
def _mimo_gcn_kernel(tile_r, a_resident,
                     a_ref, x_ref, p_ref, w_ref, b_ref,
                     wl1_ref, bl1_ref, wl2_ref, bl2_ref,
                     xss_ref, h_ref, y_ref,
                     h_scr, z_scr, copy_sem):
    e = pl.program_id(0)
    l = pl.program_id(1)
    r = pl.program_id(2)
    last_l = pl.num_programs(1) - 1
    last_r = pl.num_programs(2) - 1

    # New ensemble member: DMA its node features (bf16, HBM) straight into the
    # resident activation scratch (X never occupies a double-buffered window).
    @pl.when((l == 0) & (r == 0))
    def _():
        cp = pltpu.make_async_copy(x_ref.at[e], h_scr, copy_sem)
        cp.start()
        cp.wait()

    # Once per layer: Z = H_prev @ W_l  (bf16 MXU inputs, f32 accumulation).
    @pl.when(r == 0)
    def _():
        z = jnp.dot(h_scr[...], w_ref[0, 0],
                    preferred_element_type=jnp.float32)
        z_scr[...] = z.astype(jnp.bfloat16)

    # Aggregation for one A_hat row tile: relu(A[rows] @ Z + b).
    row0 = pl.multiple_of(r * tile_r, tile_r)
    if a_resident:
        a_tile = a_ref[0, pl.ds(row0, tile_r), :]     # slice resident A
    else:
        a_tile = a_ref[0]                             # streamed row tile
    acc = jnp.dot(a_tile, z_scr[...], preferred_element_type=jnp.float32)
    out = jnp.maximum(acc + b_ref[0, 0], 0.0)         # f32 epilogue (VPU)
    out_bf = out.astype(jnp.bfloat16)
    # NOTE: zero-padded node rows pick up relu(bias) != 0; harmless because
    # A_hat and the pooling matrix have zero columns for padded nodes and the
    # xss padding is sliced off in the wrapper.
    xss_ref[0, 0] = out_bf                            # stream xss to HBM (bf16)
    h_scr[pl.ds(row0, tile_r), :] = out_bf            # carry H_l forward (bf16)

    # Final step of this member: global mean pool + MLP head.
    @pl.when((l == last_l) & (r == last_r))
    def _():
        hp = jnp.dot(p_ref[0], h_scr[...], preferred_element_type=jnp.float32)
        h_ref[0] = hp
        z1 = jnp.maximum(
            jnp.dot(hp.astype(jnp.bfloat16), wl1_ref[0],
                    preferred_element_type=jnp.float32) + bl1_ref[0], 0.0)
        # TODO(synk): F.dropout is identity here (eval-mode / deterministic run).
        y_ref[0] = (jnp.dot(z1.astype(jnp.bfloat16), wl2_ref[0],
                            preferred_element_type=jnp.float32) + bl2_ref[0])


# ----------------------------------------------------------------------------
# VMEM sizing / tiling heuristics
# ----------------------------------------------------------------------------
def _vmem_estimate(tile_r, np_, d, gp, cp, a_resident):
    nb = 2  # default double buffering for blocked operands
    b = 0
    b += nb * (np_ * np_ if a_resident else tile_r * np_) * 2   # A_hat (bf16)
    b += nb * gp * np_ * 2                                      # pool P (bf16)
    b += nb * (d * d * 2 + d * 4)                               # W_l (bf16) + b_l (f32)
    b += nb * (d * d * 2 + d * 4)                               # Wl1 (bf16) + bl1 (f32)
    b += nb * (d * cp * 2 + cp * 4)                             # Wl2 (bf16) + bl2 (f32)
    b += nb * tile_r * d * 2                                    # xss block (bf16)
    b += nb * (gp * d * 4 + gp * cp * 4)                        # h / y blocks (f32)
    b += 2 * np_ * d * 2                                        # h_scr + z_scr (bf16)
    return b


def _vmem_cap_bytes():
    phys = 64 * 2 ** 20   # conservative default (v7x physical VMEM)
    try:
        get_info = getattr(pltpu, "get_tpu_info", None)
        if get_info is not None:
            v = getattr(get_info(), "vmem_capacity_bytes", None)
            if v:
                phys = int(v)           # 128 MiB on v5e/v6e, 64 MiB on v7x
    except Exception:
        pass
    return int(phys * 0.85)             # headroom for Mosaic internal scratch


def _choose_tiling(n_max, d, gp, cp, budget):
    """Returns (tile_r, Np, a_resident)."""
    if n_max <= 512:
        tile_r = max(_round_up(n_max, 8), 8)
        return tile_r, tile_r, True
    # Prefer a fully VMEM-resident A_hat (DMA'd once per ensemble member and
    # reused across all L layers).
    for tr in (512, 256, 128):
        np_ = _round_up(n_max, tr)
        if _vmem_estimate(tr, np_, d, gp, cp, True) <= budget:
            return tr, np_, True
    # Fall back to streaming (tile_r, Np) row tiles of A (v7x / huge graphs).
    for tr in (512, 256, 128, 64, 32, 16):
        np_ = _round_up(n_max, tr)
        if _vmem_estimate(tr, np_, d, gp, cp, False) <= budget:
            return tr, np_, False
    return 16, _round_up(n_max, 16), False


def mimo_gcn_pallas(a, x, p, w_all, b_all, wl1, bl1, wl2, bl2, *,
                    tile_r, a_resident, vmem_limit):
    """Runs all ensemble members / layers in a single tiled pallas_call."""
    E, Np, _ = a.shape
    L = w_all.shape[1]
    D = w_all.shape[2]
    Gp = p.shape[1]
    Cp = wl2.shape[2]
    R = Np // tile_r

    if a_resident:
        a_spec = pl.BlockSpec((1, Np, Np), lambda e, l, r: (e, 0, 0))
    else:
        a_spec = pl.BlockSpec((1, tile_r, Np), lambda e, l, r: (e, r, 0))

    in_specs = [
        a_spec,                                                       # A_hat
        pl.BlockSpec(memory_space=pl.ANY),                            # X (HBM, manual DMA)
        pl.BlockSpec((1, Gp, Np),  lambda e, l, r: (e, 0, 0)),        # pool P (bf16)
        pl.BlockSpec((1, 1, D, D), lambda e, l, r: (e, l, 0, 0)),     # W per layer (bf16)
        pl.BlockSpec((1, 1, 1, D), lambda e, l, r: (e, l, 0, 0)),     # b per layer (f32)
        pl.BlockSpec((1, D, D),    lambda e, l, r: (e, 0, 0)),        # Wl1 (bf16)
        pl.BlockSpec((1, 1, D),    lambda e, l, r: (e, 0, 0)),        # bl1 (f32)
        pl.BlockSpec((1, D, Cp),   lambda e, l, r: (e, 0, 0)),        # Wl2 (bf16)
        pl.BlockSpec((1, 1, Cp),   lambda e, l, r: (e, 0, 0)),        # bl2 (f32)
    ]
    out_specs = (
        pl.BlockSpec((1, 1, tile_r, D), lambda e, l, r: (e, l, r, 0)),  # xss
        pl.BlockSpec((1, Gp, D),        lambda e, l, r: (e, 0, 0)),     # h
        pl.BlockSpec((1, Gp, Cp),       lambda e, l, r: (e, 0, 0)),     # y
    )
    out_shape = (
        jax.ShapeDtypeStruct((E, L, Np, D), jnp.bfloat16),
        jax.ShapeDtypeStruct((E, Gp, D), jnp.float32),
        jax.ShapeDtypeStruct((E, Gp, Cp), jnp.float32),
    )
    scratch_shapes = [
        pltpu.VMEM((Np, D), jnp.bfloat16),   # resident activation H (bf16)
        pltpu.VMEM((Np, D), jnp.bfloat16),   # per-layer Z = H @ W (bf16)
        pltpu.SemaphoreType.DMA,             # X -> h_scr manual copy
    ]

    # TODO(synk): on v7x, use pltpu.CORE_PARALLEL (or pl.core_map) on the
    # ensemble axis to guarantee both TensorCores take distinct members.
    return pl.pallas_call(
        functools.partial(_mimo_gcn_kernel, tile_r, a_resident),
        grid=(E, L, R),
        in_specs=in_specs,
        out_specs=out_specs,
        out_shape=out_shape,
        scratch_shapes=scratch_shapes,
        compiler_params=pltpu.CompilerParams(
            dimension_semantics=("parallel", "arbitrary", "arbitrary"),
            vmem_limit_bytes=int(vmem_limit)),
    )(a, x, p, w_all, b_all, wl1, bl1, wl2, bl2)


# ----------------------------------------------------------------------------
# Plain-JAX glue: dense normalized adjacency, pooling matrix, parameters
# ----------------------------------------------------------------------------
def gcn_norm_dense(edge_index, num_nodes, edge_weight=None):
    """Dense sym-normalized adjacency with self loops (PyG GCNConv norm)."""
    src, dst = edge_index[0], edge_index[1]
    if edge_weight is None:
        edge_weight = jnp.ones(src.shape[0], jnp.float32)
    loop = jnp.arange(num_nodes, dtype=src.dtype)
    src = jnp.concatenate([src, loop])
    dst = jnp.concatenate([dst, loop])
    w = jnp.concatenate([edge_weight, jnp.ones(num_nodes, jnp.float32)])
    deg = jnp.zeros((num_nodes,), jnp.float32).at[dst].add(w)
    dinv = jnp.where(deg > 0, 1.0 / jnp.sqrt(deg), 0.0)
    norm = dinv[src] * w * dinv[dst]
    a = jnp.zeros((num_nodes, num_nodes), jnp.float32).at[dst, src].add(norm)
    return a


def mean_pool_matrix(batch, num_graphs):
    onehot = (batch[None, :] == jnp.arange(num_graphs)[:, None]).astype(jnp.float32)
    counts = jnp.maximum(onehot.sum(axis=1, keepdims=True), 1.0)
    return onehot / counts


def init_params(key, in_dim, hidden, num_classes, num_layers, num_ensemble):
    keys = jax.random.split(key, 8)
    s = 0.1
    return {
        # per-ensemble first GCN conv
        "w1": s * jax.random.normal(keys[0], (num_ensemble, in_dim, hidden), jnp.float32),
        "b1": s * jax.random.normal(keys[1], (num_ensemble, 1, hidden), jnp.float32),
        # shared hidden GCN convs
        "ws": s * jax.random.normal(keys[2], (num_layers - 1, hidden, hidden), jnp.float32),
        "bs": s * jax.random.normal(keys[3], (num_layers - 1, 1, hidden), jnp.float32),
        # per-ensemble MLP head
        "wl1": s * jax.random.normal(keys[4], (num_ensemble, hidden, hidden), jnp.float32),
        "bl1": s * jax.random.normal(keys[5], (num_ensemble, 1, hidden), jnp.float32),
        "wl2": s * jax.random.normal(keys[6], (num_ensemble, hidden, num_classes), jnp.float32),
        "bl2": s * jax.random.normal(keys[7], (num_ensemble, 1, num_classes), jnp.float32),
    }


def mimo_gcn_forward(datas, params, num_graphs):
    """Mirrors mimoGCN.forward: returns ([edge_index_list, xss, hs], ys)."""
    E = params["w1"].shape[0]
    in_dim = params["w1"].shape[1]
    hidden = params["w1"].shape[2]
    L = 1 + params["ws"].shape[0]
    num_classes = params["wl2"].shape[2]

    # Lane-dense padded sizes.  NOTE: padding a small hidden dim up to 128
    # wastes MXU work / xss bandwidth on zeros; prefer hidden % 128 == 0 for
    # real workloads.
    D = _round_up(max(in_dim, hidden), 128)
    Cp = _round_up(num_classes, 128)
    Gp = _round_up(num_graphs, 8)

    n_max = max(d[0].shape[0] for d in datas)
    cap = _vmem_cap_bytes()
    budget = max(cap - (8 << 20), 16 << 20)
    tile_r, Np, a_resident = _choose_tiling(n_max, D, Gp, Cp, budget)
    est = _vmem_estimate(tile_r, Np, D, Gp, Cp, a_resident)
    vmem_limit = int(min(cap, max(2 * est, 32 << 20)))

    # Build / pad / stack graph tensors per ensemble member.  The big operands
    # (A_hat, X, P) are stored bf16; biases stay f32.
    a_list, x_list, p_list, edge_index_list, n_list = [], [], [], [], []
    for i in range(E):
        x, edge_index, batch, ew = datas[i]
        n = x.shape[0]
        n_list.append(n)
        edge_index_list.append(edge_index)
        a_list.append(_pad_to(gcn_norm_dense(edge_index, n, ew), (Np, Np)))
        x_list.append(_pad_to(x.astype(jnp.float32), (Np, D)))
        p_list.append(_pad_to(mean_pool_matrix(batch, num_graphs), (Gp, Np)))
    a_stack = jnp.stack(a_list).astype(jnp.bfloat16)
    # NOTE: X is downcast to bf16 before the first layer (MXU input dtype);
    # this is the main source of the ~1e-2 deviation vs. the f32 reference.
    x_stack = jnp.stack(x_list).astype(jnp.bfloat16)
    p_stack = jnp.stack(p_list).astype(jnp.bfloat16)

    # Stack per-layer weights per member: layer 0 = member's conv1, rest shared.
    # Matmul operands pre-cast to bf16 in the wrapper (no in-kernel casts).
    w1p = _pad_to(params["w1"], (E, D, D))
    b1p = _pad_to(params["b1"], (E, 1, D))
    wsp = _pad_to(params["ws"], (L - 1, D, D))
    bsp = _pad_to(params["bs"], (L - 1, 1, D))
    w_all = jnp.concatenate(
        [w1p[:, None], jnp.broadcast_to(wsp[None], (E, L - 1, D, D))],
        axis=1).astype(jnp.bfloat16)
    b_all = jnp.concatenate(
        [b1p[:, None, :, :], jnp.broadcast_to(bsp[None], (E, L - 1, 1, D))],
        axis=1).astype(jnp.float32)

    wl1p = _pad_to(params["wl1"], (E, D, D)).astype(jnp.bfloat16)
    bl1p = _pad_to(params["bl1"], (E, 1, D)).astype(jnp.float32)
    wl2p = _pad_to(params["wl2"], (E, D, Cp)).astype(jnp.bfloat16)
    bl2p = _pad_to(params["bl2"], (E, 1, Cp)).astype(jnp.float32)

    xss_pad, h_pad, y_pad = mimo_gcn_pallas(
        a_stack, x_stack, p_stack, w_all, b_all,
        wl1p, bl1p, wl2p, bl2p,
        tile_r=tile_r, a_resident=a_resident, vmem_limit=vmem_limit)

    xss, hs, ys = [], [], []
    for i in range(E):
        n = n_list[i]
        xss.append([xss_pad[i, l, :n, :hidden] for l in range(L)])
        hs.append(h_pad[i, :num_graphs, :hidden])
        ys.append(y_pad[i, :num_graphs, :num_classes])
    return ([edge_index_list, xss, hs], ys)


# ----------------------------------------------------------------------------
# Pure-JAX f32 reference (for a correctness sanity check)
# ----------------------------------------------------------------------------
def _reference_member(a_hat, x, pool_mat, w1, b1, ws, bs, wl1, bl1, wl2, bl2):
    h = jnp.maximum(a_hat @ (x @ w1) + b1, 0.0)
    xs = [h]
    for l in range(ws.shape[0]):
        h = jnp.maximum(a_hat @ (h @ ws[l]) + bs[l], 0.0)
        xs.append(h)
    hp = pool_mat @ h
    z = jnp.maximum(hp @ wl1 + bl1, 0.0)
    y = z @ wl2 + bl2
    return jnp.stack(xs), hp, y


# ----------------------------------------------------------------------------
if __name__ == "__main__":
    IN_DIM, HIDDEN, NUM_CLASSES = 8, 32, 4
    NUM_LAYERS, NUM_ENSEMBLE = 3, 2
    N_NODES, NUM_GRAPHS = 16, 2

    key = jax.random.PRNGKey(0)
    pkey, *dkeys = jax.random.split(key, 1 + NUM_ENSEMBLE)
    params = init_params(pkey, IN_DIM, HIDDEN, NUM_CLASSES, NUM_LAYERS, NUM_ENSEMBLE)

    # One small batched graph per ensemble member: nodes 0..7 -> graph 0,
    # nodes 8..15 -> graph 1; bidirectional ring within each graph.
    def make_graph(k):
        x = jax.random.normal(k, (N_NODES, IN_DIM), jnp.float32)
        src, dst = [], []
        for g in range(NUM_GRAPHS):
            base, sz = g * (N_NODES // NUM_GRAPHS), N_NODES // NUM_GRAPHS
            for j in range(sz):
                a, b = base + j, base + (j + 1) % sz
                src += [a, b]
                dst += [b, a]
        edge_index = jnp.array([src, dst], dtype=jnp.int32)
        batch = jnp.repeat(jnp.arange(NUM_GRAPHS, dtype=jnp.int32),
                           N_NODES // NUM_GRAPHS)
        return (x, edge_index, batch, None)  # edge_weight = None

    datas = [make_graph(dkeys[i]) for i in range(NUM_ENSEMBLE)]

    (aux, ys) = mimo_gcn_forward(datas, params, NUM_GRAPHS)
    jax.block_until_ready(ys)

    # Sanity check vs. plain-JAX f32 reference (bf16 MXU inputs / bf16-carried
    # activations -> loose tolerance).
    ok = True
    for i in range(NUM_ENSEMBLE):
        x, edge_index, batch, ew = datas[i]
        a_hat = gcn_norm_dense(edge_index, N_NODES, ew)
        pool_mat = mean_pool_matrix(batch, NUM_GRAPHS)
        xs_ref, h_ref, y_ref = _reference_member(
            a_hat, x, pool_mat,
            params["w1"][i], params["b1"][i], params["ws"], params["bs"],
            params["wl1"][i], params["bl1"][i], params["wl2"][i], params["bl2"][i])
        xs_ker = np.asarray(jnp.stack(aux[1][i]).astype(jnp.float32))
        ok &= np.allclose(xs_ker, np.asarray(xs_ref), atol=3e-2, rtol=3e-2)
        ok &= np.allclose(np.asarray(aux[2][i]), np.asarray(h_ref), atol=3e-2, rtol=3e-2)
        ok &= np.allclose(np.asarray(ys[i]), np.asarray(y_ref), atol=3e-2, rtol=3e-2)

    if not ok:
        raise AssertionError("Pallas kernel output mismatch vs JAX reference")
    print("KERNEL_OK")
</pallas_src>

<mosaic_0001>
module attributes {stable_mosaic.version = 11 : i64} {
  func.func @_mimo_gcn_kernel(%arg0: i32, %arg1: i32, %arg2: i32, %arg3: memref<1x16x16xbf16, #tpu.memory_space<vmem>>, %arg4: memref<2x16x128xbf16, #tpu.memory_space<any>>, %arg5: memref<1x8x16xbf16, #tpu.memory_space<vmem>>, %arg6: memref<1x1x128x128xbf16, #tpu.memory_space<vmem>>, %arg7: memref<1x1x1x128xf32, #tpu.memory_space<vmem>>, %arg8: memref<1x128x128xbf16, #tpu.memory_space<vmem>>, %arg9: memref<1x1x128xf32, #tpu.memory_space<vmem>>, %arg10: memref<1x128x128xbf16, #tpu.memory_space<vmem>>, %arg11: memref<1x1x128xf32, #tpu.memory_space<vmem>>, %arg12: memref<1x1x16x128xbf16, #tpu.memory_space<vmem>>, %arg13: memref<1x8x128xf32, #tpu.memory_space<vmem>>, %arg14: memref<1x8x128xf32, #tpu.memory_space<vmem>>, %arg15: memref<16x128xbf16, #tpu.memory_space<vmem>>, %arg16: memref<16x128xbf16, #tpu.memory_space<vmem>>, %arg17: memref<!tpu.dma_semaphore, #tpu.memory_space<semaphore_mem>>) attributes {dimension_semantics = [#tpu.dimension_semantics<parallel>, #tpu.dimension_semantics<arbitrary>, #tpu.dimension_semantics<arbitrary>], iteration_bounds = array<i64: 2, 3, 1>, scalar_prefetch = 0 : i64, scratch_operands = 3 : i64, tpu.core_type = #tpu.core_type<tc>, window_params = [{transform_indices = @transform_0, window_bounds = array<i64: 1, 16, 16>}, {}, {transform_indices = @transform_2, window_bounds = array<i64: 1, 8, 16>}, {transform_indices = @transform_3, window_bounds = array<i64: 1, 1, 128, 128>}, {transform_indices = @transform_4, window_bounds = array<i64: 1, 1, 1, 128>}, {transform_indices = @transform_5, window_bounds = array<i64: 1, 128, 128>}, {transform_indices = @transform_6, window_bounds = array<i64: 1, 1, 128>}, {transform_indices = @transform_7, window_bounds = array<i64: 1, 128, 128>}, {transform_indices = @transform_8, window_bounds = array<i64: 1, 1, 128>}, {transform_indices = @transform_9, window_bounds = array<i64: 1, 1, 16, 128>}, {transform_indices = @transform_10, window_bounds = array<i64: 1, 8, 128>}, {transform_indices = @transform_11, window_bounds = array<i64: 1, 8, 128>}]} {
    %c0_i32 = arith.constant 0 : i32
    %0 = arith.cmpi eq, %arg1, %c0_i32 : i32
    %c0_i32_0 = arith.constant 0 : i32
    %1 = arith.cmpi eq, %arg2, %c0_i32_0 : i32
    %2 = arith.andi %0, %1 : i1
    %3 = arith.extui %2 : i1 to i32
    %c0_i32_1 = arith.constant 0 : i32
    %4 = arith.cmpi ne, %3, %c0_i32_1 : i32
    scf.if %4 {
      %c0_i32_19 = arith.constant 0 : i32
      %c0_i32_20 = arith.constant 0 : i32
      %32 = tpu.memref_slice %arg4[%arg0, %c0_i32_19, %c0_i32_20] : memref<2x16x128xbf16, #tpu.memory_space<any>> -> memref<1x16x128xbf16, #tpu.memory_space<any>>
      %33 = tpu.memref_squeeze %32 : memref<1x16x128xbf16, #tpu.memory_space<any>> -> memref<16x128xbf16, #tpu.memory_space<any>>
      tpu.enqueue_dma source(%33 : memref<16x128xbf16, #tpu.memory_space<any>>) target(%arg15 : memref<16x128xbf16, #tpu.memory_space<vmem>>) target_semaphore(%arg17 : memref<!tpu.dma_semaphore, #tpu.memory_space<semaphore_mem>>)
      %c0_i32_21 = arith.constant 0 : i32
      %c0_i32_22 = arith.constant 0 : i32
      %34 = tpu.memref_slice %arg4[%arg0, %c0_i32_21, %c0_i32_22] : memref<2x16x128xbf16, #tpu.memory_space<any>> -> memref<1x16x128xbf16, #tpu.memory_space<any>>
      %35 = tpu.memref_squeeze %34 : memref<1x16x128xbf16, #tpu.memory_space<any>> -> memref<16x128xbf16, #tpu.memory_space<any>>
      tpu.wait_dma2 semaphore(%arg17 : memref<!tpu.dma_semaphore, #tpu.memory_space<semaphore_mem>>) src(%35 : memref<16x128xbf16, #tpu.memory_space<any>>) dst(%arg15 : memref<16x128xbf16, #tpu.memory_space<vmem>>)
    } else {
    }
    %c0_i32_2 = arith.constant 0 : i32
    %5 = arith.cmpi eq, %arg2, %c0_i32_2 : i32
    %6 = arith.extui %5 : i1 to i32
    %c0_i32_3 = arith.constant 0 : i32
    %7 = arith.cmpi ne, %6, %c0_i32_3 : i32
    scf.if %7 {
      %c0_19 = arith.constant 0 : index
      %c0_20 = arith.constant 0 : index
      %32 = vector.load %arg15[%c0_19, %c0_20] : memref<16x128xbf16, #tpu.memory_space<vmem>>, vector<16x128xbf16>
      %c0_21 = arith.constant 0 : index
      %c0_22 = arith.constant 0 : index
      %c0_23 = arith.constant 0 : index
      %c0_24 = arith.constant 0 : index
      %33 = vector.load %arg6[%c0_21, %c0_22, %c0_23, %c0_24] : memref<1x1x128x128xbf16, #tpu.memory_space<vmem>>, vector<1x1x128x128xbf16>
      %34 = vector.shape_cast %33 : vector<1x1x128x128xbf16> to vector<128x128xbf16>
      %cst_25 = arith.constant dense<0.000000e+00> : vector<16x128xf32>
      %35 = tpu.matmul %32, %34, %cst_25 {dimension_numbers = #tpu.dot_dimension_numbers<[1], [0], [0], [1], [0, 0, 1, 1], [], []>} : vector<16x128xbf16>, vector<128x128xbf16>, vector<16x128xf32> -> vector<16x128xf32>
      %36 = arith.truncf %35 : vector<16x128xf32> to vector<16x128xbf16>
      %c0_26 = arith.constant 0 : index
      %c0_27 = arith.constant 0 : index
      %37 = vector.load %arg16[%c0_26, %c0_27] : memref<16x128xbf16, #tpu.memory_space<vmem>>, vector<16x128xbf16>
      tpu.vector_store %arg16[%c0_26, %c0_27], %36 {strides = array<i32>} : memref<16x128xbf16, #tpu.memory_space<vmem>>, vector<16x128xbf16>,
    } else {
    }
    %c16_i32 = arith.constant 16 : i32
    %8 = arith.muli %arg2, %c16_i32 : i32
    %9 = tpu.assume_multiple %8, 16 : i32
    %c0 = arith.constant 0 : index
    %10 = arith.index_cast %9 : i32 to index
    %c0_4 = arith.constant 0 : index
    %11 = vector.load %arg3[%c0, %10, %c0_4] : memref<1x16x16xbf16, #tpu.memory_space<vmem>>, vector<1x16x16xbf16>
    %12 = vector.shape_cast %11 : vector<1x16x16xbf16> to vector<16x16xbf16>
    %c0_5 = arith.constant 0 : index
    %c0_6 = arith.constant 0 : index
    %13 = vector.load %arg16[%c0_5, %c0_6] : memref<16x128xbf16, #tpu.memory_space<vmem>>, vector<16x128xbf16>
    %cst = arith.constant dense<0.000000e+00> : vector<16x128xf32>
    %14 = tpu.matmul %12, %13, %cst {dimension_numbers = #tpu.dot_dimension_numbers<[1], [0], [0], [1], [0, 0, 1, 1], [], []>} : vector<16x16xbf16>, vector<16x128xbf16>, vector<16x128xf32> -> vector<16x128xf32>
    %c0_7 = arith.constant 0 : index
    %c0_8 = arith.constant 0 : index
    %c0_9 = arith.constant 0 : index
    %c0_10 = arith.constant 0 : index
    %15 = vector.load %arg7[%c0_7, %c0_8, %c0_9, %c0_10] : memref<1x1x1x128xf32, #tpu.memory_space<vmem>>, vector<1x1x1x128xf32>
    %16 = vector.shape_cast %15 : vector<1x1x1x128xf32> to vector<1x128xf32>
    %17 = vector.broadcast %16 : vector<1x128xf32> to vector<16x128xf32>
    %18 = arith.addf %14, %17 : vector<16x128xf32>
    %cst_11 = arith.constant 0.000000e+00 : f32
    %19 = vector.broadcast %cst_11 : f32 to vector<16x128xf32>
    %20 = arith.maximumf %18, %19 : vector<16x128xf32>
    %21 = arith.truncf %20 : vector<16x128xf32> to vector<16x128xbf16>
    %c0_12 = arith.constant 0 : index
    %c0_13 = arith.constant 0 : index
    %c0_14 = arith.constant 0 : index
    %c0_15 = arith.constant 0 : index
    %22 = vector.load %arg12[%c0_12, %c0_13, %c0_14, %c0_15] : memref<1x1x16x128xbf16, #tpu.memory_space<vmem>>, vector<1x1x16x128xbf16>
    %23 = vector.shape_cast %22 : vector<1x1x16x128xbf16> to vector<16x128xbf16>
    %24 = vector.shape_cast %21 : vector<16x128xbf16> to vector<1x1x16x128xbf16>
    tpu.vector_store %arg12[%c0_12, %c0_13, %c0_14, %c0_15], %24 {strides = array<i32>} : memref<1x1x16x128xbf16, #tpu.memory_space<vmem>>, vector<1x1x16x128xbf16>,
    %25 = arith.index_cast %9 : i32 to index
    %c0_16 = arith.constant 0 : index
    %26 = vector.load %arg15[%25, %c0_16] : memref<16x128xbf16, #tpu.memory_space<vmem>>, vector<16x128xbf16>
    tpu.vector_store %arg15[%25, %c0_16], %21 {strides = array<i32>} : memref<16x128xbf16, #tpu.memory_space<vmem>>, vector<16x128xbf16>,
    %c2_i32 = arith.constant 2 : i32
    %27 = arith.cmpi eq, %arg1, %c2_i32 : i32
    %c0_i32_17 = arith.constant 0 : i32
    %28 = arith.cmpi eq, %arg2, %c0_i32_17 : i32
    %29 = arith.andi %27, %28 : i1
    %30 = arith.extui %29 : i1 to i32
    %c0_i32_18 = arith.constant 0 : i32
    %31 = arith.cmpi ne, %30, %c0_i32_18 : i32
    scf.if %31 {
      %c0_19 = arith.constant 0 : index
      %c0_20 = arith.constant 0 : index
      %c0_21 = arith.constant 0 : index
      %32 = vector.load %arg5[%c0_19, %c0_20, %c0_21] : memref<1x8x16xbf16, #tpu.memory_space<vmem>>, vector<1x8x16xbf16>
      %33 = vector.shape_cast %32 : vector<1x8x16xbf16> to vector<8x16xbf16>
      %c0_22 = arith.constant 0 : index
      %c0_23 = arith.constant 0 : index
      %34 = vector.load %arg15[%c0_22, %c0_23] : memref<16x128xbf16, #tpu.memory_space<vmem>>, vector<16x128xbf16>
      %cst_24 = arith.constant dense<0.000000e+00> : vector<8x128xf32>
      %35 = tpu.matmul %33, %34, %cst_24 {dimension_numbers = #tpu.dot_dimension_numbers<[1], [0], [0], [1], [0, 0, 1, 1], [], []>} : vector<8x16xbf16>, vector<16x128xbf16>, vector<8x128xf32> -> vector<8x128xf32>
      %c0_25 = arith.constant 0 : index
      %c0_26 = arith.constant 0 : index
      %c0_27 = arith.constant 0 : index
      %36 = vector.load %arg13[%c0_25, %c0_26, %c0_27] : memref<1x8x128xf32, #tpu.memory_space<vmem>>, vector<1x8x128xf32>
      %37 = vector.shape_cast %36 : vector<1x8x128xf32> to vector<8x128xf32>
      %38 = vector.shape_cast %35 : vector<8x128xf32> to vector<1x8x128xf32>
      tpu.vector_store %arg13[%c0_25, %c0_26, %c0_27], %38 {strides = array<i32>} : memref<1x8x128xf32, #tpu.memory_space<vmem>>, vector<1x8x128xf32>,
      %39 = arith.truncf %35 : vector<8x128xf32> to vector<8x128xbf16>
      %c0_28 = arith.constant 0 : index
      %c0_29 = arith.constant 0 : index
      %c0_30 = arith.constant 0 : index
      %40 = vector.load %arg8[%c0_28, %c0_29, %c0_30] : memref<1x128x128xbf16, #tpu.memory_space<vmem>>, vector<1x128x128xbf16>
      %41 = vector.shape_cast %40 : vector<1x128x128xbf16> to vector<128x128xbf16>
      %cst_31 = arith.constant dense<0.000000e+00> : vector<8x128xf32>
      %42 = tpu.matmul %39, %41, %cst_31 {dimension_numbers = #tpu.dot_dimension_numbers<[1], [0], [0], [1], [0, 0, 1, 1], [], []>} : vector<8x128xbf16>, vector<128x128xbf16>, vector<8x128xf32> -> vector<8x128xf32>
      %c0_32 = arith.constant 0 : index
      %c0_33 = arith.constant 0 : index
      %c0_34 = arith.constant 0 : index
      %43 = vector.load %arg9[%c0_32, %c0_33, %c0_34] : memref<1x1x128xf32, #tpu.memory_space<vmem>>, vector<1x1x128xf32>
      %44 = vector.shape_cast %43 : vector<1x1x128xf32> to vector<1x128xf32>
      %45 = vector.broadcast %44 : vector<1x128xf32> to vector<8x128xf32>
      %46 = arith.addf %42, %45 : vector<8x128xf32>
      %cst_35 = arith.constant 0.000000e+00 : f32
      %47 = vector.broadcast %cst_35 : f32 to vector<8x128xf32>
      %48 = arith.maximumf %46, %47 : vector<8x128xf32>
      %49 = arith.truncf %48 : vector<8x128xf32> to vector<8x128xbf16>
      %c0_36 = arith.constant 0 : index
      %c0_37 = arith.constant 0 : index
      %c0_38 = arith.constant 0 : index
      %50 = vector.load %arg10[%c0_36, %c0_37, %c0_38] : memref<1x128x128xbf16, #tpu.memory_space<vmem>>, vector<1x128x128xbf16>
      %51 = vector.shape_cast %50 : vector<1x128x128xbf16> to vector<128x128xbf16>
      %cst_39 = arith.constant dense<0.000000e+00> : vector<8x128xf32>
      %52 = tpu.matmul %49, %51, %cst_39 {dimension_numbers = #tpu.dot_dimension_numbers<[1], [0], [0], [1], [0, 0, 1, 1], [], []>} : vector<8x128xbf16>, vector<128x128xbf16>, vector<8x128xf32> -> vector<8x128xf32>
      %c0_40 = arith.constant 0 : index
      %c0_41 = arith.constant 0 : index
      %c0_42 = arith.constant 0 : index
      %53 = vector.load %arg11[%c0_40, %c0_41, %c0_42] : memref<1x1x128xf32, #tpu.memory_space<vmem>>, vector<1x1x128xf32>
      %54 = vector.shape_cast %53 : vector<1x1x128xf32> to vector<1x128xf32>
      %55 = vector.broadcast %54 : vector<1x128xf32> to vector<8x128xf32>
      %56 = arith.addf %52, %55 : vector<8x128xf32>
      %c0_43 = arith.constant 0 : index
      %c0_44 = arith.constant 0 : index
      %c0_45 = arith.constant 0 : index
      %57 = vector.load %arg14[%c0_43, %c0_44, %c0_45] : memref<1x8x128xf32, #tpu.memory_space<vmem>>, vector<1x8x128xf32>
      %58 = vector.shape_cast %57 : vector<1x8x128xf32> to vector<8x128xf32>
      %59 = vector.shape_cast %56 : vector<8x128xf32> to vector<1x8x128xf32>
      tpu.vector_store %arg14[%c0_43, %c0_44, %c0_45], %59 {strides = array<i32>} : memref<1x8x128xf32, #tpu.memory_space<vmem>>, vector<1x8x128xf32>,
    } else {
    }
    return
  }
  func.func @transform_0(%arg0: i32, %arg1: i32, %arg2: i32) -> (i32, i32, i32) {
    %c0_i32 = arith.constant 0 : i32
    %c0_i32_0 = arith.constant 0 : i32
    %c0_i32_1 = arith.constant 0 : i32
    return %arg0, %c0_i32, %c0_i32_0 : i32, i32, i32
  }
  func.func @transform_2(%arg0: i32, %arg1: i32, %arg2: i32) -> (i32, i32, i32) {
    %c0_i32 = arith.constant 0 : i32
    %c0_i32_0 = arith.constant 0 : i32
    %c0_i32_1 = arith.constant 0 : i32
    return %arg0, %c0_i32, %c0_i32_0 : i32, i32, i32
  }
  func.func @transform_3(%arg0: i32, %arg1: i32, %arg2: i32) -> (i32, i32, i32, i32) {
    %c0_i32 = arith.constant 0 : i32
    %c0_i32_0 = arith.constant 0 : i32
    %c0_i32_1 = arith.constant 0 : i32
    return %arg0, %arg1, %c0_i32, %c0_i32_0 : i32, i32, i32, i32
  }
  func.func @transform_4(%arg0: i32, %arg1: i32, %arg2: i32) -> (i32, i32, i32, i32) {
    %c0_i32 = arith.constant 0 : i32
    %c0_i32_0 = arith.constant 0 : i32
    %c0_i32_1 = arith.constant 0 : i32
    return %arg0, %arg1, %c0_i32, %c0_i32_0 : i32, i32, i32, i32
  }
  func.func @transform_5(%arg0: i32, %arg1: i32, %arg2: i32) -> (i32, i32, i32) {
    %c0_i32 = arith.constant 0 : i32
    %c0_i32_0 = arith.constant 0 : i32
    %c0_i32_1 = arith.constant 0 : i32
    return %arg0, %c0_i32, %c0_i32_0 : i32, i32, i32
  }
  func.func @transform_6(%arg0: i32, %arg1: i32, %arg2: i32) -> (i32, i32, i32) {
    %c0_i32 = arith.constant 0 : i32
    %c0_i32_0 = arith.constant 0 : i32
    %c0_i32_1 = arith.constant 0 : i32
    return %arg0, %c0_i32, %c0_i32_0 : i32, i32, i32
  }
  func.func @transform_7(%arg0: i32, %arg1: i32, %arg2: i32) -> (i32, i32, i32) {
    %c0_i32 = arith.constant 0 : i32
    %c0_i32_0 = arith.constant 0 : i32
    %c0_i32_1 = arith.constant 0 : i32
    return %arg0, %c0_i32, %c0_i32_0 : i32, i32, i32
  }
  func.func @transform_8(%arg0: i32, %arg1: i32, %arg2: i32) -> (i32, i32, i32) {
    %c0_i32 = arith.constant 0 : i32
    %c0_i32_0 = arith.constant 0 : i32
    %c0_i32_1 = arith.constant 0 : i32
    return %arg0, %c0_i32, %c0_i32_0 : i32, i32, i32
  }
  func.func @transform_9(%arg0: i32, %arg1: i32, %arg2: i32) -> (i32, i32, i32, i32) {
    %c0_i32 = arith.constant 0 : i32
    %c0_i32_0 = arith.constant 0 : i32
    return %arg0, %arg1, %arg2, %c0_i32 : i32, i32, i32, i32
  }
  func.func @transform_10(%arg0: i32, %arg1: i32, %arg2: i32) -> (i32, i32, i32) {
    %c0_i32 = arith.constant 0 : i32
    %c0_i32_0 = arith.constant 0 : i32
    %c0_i32_1 = arith.constant 0 : i32
    return %arg0, %c0_i32, %c0_i32_0 : i32, i32, i32
  }
  func.func @transform_11(%arg0: i32, %arg1: i32, %arg2: i32) -> (i32, i32, i32) {
    %c0_i32 = arith.constant 0 : i32
    %c0_i32_0 = arith.constant 0 : i32
    %c0_i32_1 = arith.constant 0 : i32
    return %arg0, %c0_i32, %c0_i32_0 : i32, i32, i32
  }
}

</mosaic_0001>

<bundles_post_ra>
// kernel: tpu_custom_call.1
= control target key start
LH: loop header
LB: loop body
LE: loop exit
PB: predicated region body
PF: predicated region fallthrough
CT: control target
= control target key end

     0   :  { %s2929_s0 = inlined_call_operand.hbm [shape: bf16[2,16,16], index: 0, kind: input, shape index: {}]   ;;  %s2930_s1 = inlined_call_operand.hbm [shape: bf16[2,16,128], index: 1, kind: input, shape index: {}]   ;;  %s2931_s2 = inlined_call_operand.hbm [shape: bf16[2,8,16], index: 2, kind: input, shape index: {}]   ;;  %s2932_s3 = inlined_call_operand.hbm [shape: bf16[2,3,128,128], index: 3, kind: input, shape index: {}]   ;;  %s2933_s4 = inlined_call_operand.vmem [shape: f32[2,3,1,128], index: 4, kind: input, shape index: {}]   ;;  %s2934_s5 = inlined_call_operand.hbm [shape: bf16[2,128,128], index: 5, kind: input, shape index: {}]   ;;  %s2935_s6 = inlined_call_operand.vmem [shape: f32[2,1,128], index: 6, kind: input, shape index: {}]   ;;  %s2936_s7 = inlined_call_operand.hbm [shape: bf16[2,128,128], index: 7, kind: input, shape index: {}]   ;;  %s2937_s8 = inlined_call_operand.vmem [shape: f32[2,1,128], index: 8, kind: input, shape index: {}]   ;;  %s2938_s9 = inlined_call_operand.hbm [shape: bf16[2,3,16,128], index: 9, kind: output, shape index: {0}]   ;;  %s2939_s10 = inlined_call_operand.hbm [shape: f32[2,8,128], index: 10, kind: output, shape index: {1}]   ;;  %s2940_s11 = inlined_call_operand.hbm [shape: f32[2,8,128], index: 11, kind: output, shape index: {2}]  }
   0x1   :  { %2986 = sst [smem:[#allocation50_spill]] %s2929_s0 }
   0x2   :  { %2987 = sst [smem:[#allocation51_spill]] %s2930_s1 }
   0x3   :  { %2988 = sst [smem:[#allocation52_spill]] %s2931_s2 }
   0x4   :  { %2989 = sst [smem:[#allocation53_spill]] %s2932_s3 }
   0x5   :  { %2990 = sst [smem:[#allocation54_spill]] %s2933_s4 }
   0x6   :  { %2991 = sst [smem:[#allocation55_spill]] %s2934_s5 }
   0x7   :  { %2992 = sst [smem:[#allocation56_spill]] %s2935_s6 }
   0x8   :  { %2993 = sst [smem:[#allocation57_spill]] %s2936_s7 }
   0x9   :  { %2994 = sst [smem:[#allocation58_spill]] %s2937_s8 }
   0xa   :  { %2995 = sst [smem:[#allocation59_spill]] %s2938_s9 }
   0xb   :  { %2996 = sst [smem:[#allocation60_spill]] %s2939_s10 }
   0xc   :  { %2997 = sst [smem:[#allocation61_spill]] %s2940_s11 }
   0xd   :  { %17 = vsyncpa [#allocation6], 0 }
   0xe   :  { %19 = vsyncpa [#allocation6 + $0x1], 0 }
   0xf   :  { %20 = vsyncpa [#allocation9], 0 }
  0x10   :  { %22 = vsyncpa [#allocation9 + $0x1], 0 }
  0x11   :  { %23 = vsyncpa [#allocation12], 0 }
  0x12   :  { %25 = vsyncpa [#allocation12 + $0x1], 0 }
  0x13   :  { %26 = vsyncpa [#allocation7], 0 }
  0x14   :  { %28 = vsyncpa [#allocation7 + $0x1], 0 }
  0x15   :  { %29 = vsyncpa [#allocation16], 0 }
  0x16   :  { %31 = vsyncpa [#allocation16 + $0x1], 0  ;;  %s2283_s17 = smov 0   ;;  %s2285_s18 = smov 0  }
  0x17   :  { %s2287_s19 = smov 0   ;;  %s2289_s20 = smov 0  }
  0x18   :  { %s2291_s21 = smov 0   ;;  %s2293_s22 = smov 0  }
  0x19   :  { %s2295_s23 = smov 0   ;;  %s2297_s24 = smov 0  }
  0x1a   :  { %s2299_s25 = smov 0   ;;  %s2301_s26 = smov 0  }
  0x1b   :  { %s2303_s27 = smov 0  }
  0x1c LB: > { %2998 = sst [smem:[#allocation29_spill]] %s2164_s17  ;;  %s2337_s28 = sadd.s32 4294967295, %s2204_s27   ;;  %s2204_s27 = sphi %s2303_s27, %s37_s27   ;;  %s2200_s26 = sphi %s2301_s26, %s3090_s26   ;;  %s2196_s25 = sphi %s2299_s25, %s3089_s25   ;;  %s2192_s24 = sphi %s2297_s24, %s3088_s24   ;;  %s2188_s23 = sphi %s2295_s23, %s3087_s23   ;;  %s2184_s22 = sphi %s2293_s22, %s3086_s22   ;;  %s2180_s21 = sphi %s2291_s21, %s3085_s21   ;;  %s2176_s20 = sphi %s2289_s20, %s3084_s20   ;;  %s2172_s19 = sphi %s2287_s19, %s3083_s19   ;;  %s2168_s18 = sphi %s2285_s18, %s3082_s18   ;;  %s2164_s17 = sphi %s2283_s17, %s3081_s17  }
  0x1d   : > { %2999 = sst [smem:[#allocation30_spill]] %s2168_s18  ;;  %s2944_s29 = sadd.s32 4294967294, %s2204_s27  }
  0x1e   : > { %3000 = sst [smem:[#allocation31_spill]] %s2172_s19  ;;  %p70_p0 = scmp.ne.s32.totalorder %s2184_s22, %s2180_s21 }
  0x1f   : > { %3001 = sst [smem:[#allocation32_spill]] %s2180_s21  ;;  %p71_p1 = scmp.eq.s32.totalorder %s2204_s27, 0 }
  0x20   : > { %3002 = sst [smem:[#allocation33_spill]] %s2184_s22  ;;  %p76_p2 = scmp.ne.s32.totalorder %s2180_s21, %s2176_s20 }
  0x21   : > { %3003 = sst [smem:[#allocation34_spill]] %s2188_s23  ;;  %p77_p3 = scmp.eq.s32.totalorder %s2337_s28, 0 }
  0x22   : > { %3004 = sst [smem:[#allocation35_spill]] %s2192_s24  ;;  %p124_p4 = scmp.ne.s32.totalorder %s2172_s19, %s2168_s18 }
  0x23   : > { %3005 = sst [smem:[#allocation36_spill]] %s2196_s25  ;;  %p2350_p5 = por %p71_p1, %p70_p0 }
  0x24   : > { %3006 = sst [smem:[#allocation37_spill]] %s2200_s26  ;;  %p130_p6 = scmp.ne.s32.totalorder %s2168_s18, %s2164_s17 }
  0x25   : > { %3007 = sst [smem:[#allocation38_spill]] %s2204_s27  ;;  %p2358_p7 = por %p77_p3, %p76_p2 }
  0x26   : > { %3008 = sst [smem:[#allocation39_spill]] %s2337_s28  ;;  %p2362_p8 = por %p124_p4, %p71_p1 }
  0x27   : > { %s3010_s12 = scalar_select %p2358_p7, 1, 0 }
  0x28   : > { %p2366_p9 = por %p130_p6, %p77_p3  ;;  %p290_p10 = scmp.eq.s32.totalorder %s2337_s28, 5 }
  0x29   : > { %3011 = sst [smem:[#allocation40_spill]] %s3010_s12  ;;  %p296_p11 = scmp.eq.s32.totalorder %s2944_s29, 5 }
  0x2a   : > { %s3013_s14 = scalar_select %p2366_p9, 1, 0 }
  0x2b   : > { %p2373_p12 = por %p290_p10, %p124_p4  ;;  %p2380_p13 = por %p290_p10, %p70_p0 }
  0x2c   : > { %3014 = sst [smem:[#allocation41_spill]] %s3013_s14  ;;  %p2384_p1 = por %p296_p11, %p130_p6 }
  0x2d   : > { %s3015_s15 = scalar_select %p2373_p12, 1, 0 }
  0x2e   : > { %s3017_s16 = scalar_select %p2380_p13, 1, 0 }
  0x2f   : > { %3016 = sst [smem:[#allocation42_spill]] %s3015_s15  ;;  %p2390_p3 = por %p296_p11, %p76_p2 }
  0x30   : > { %3018 = sst [smem:[#allocation43_spill]] %s3017_s16  ;;  %p1704_p9 = scmp.lt.s32.totalorder %s2204_s27, 6 }
  0x31   : > { %s3019_s17 = scalar_select %p2384_p1, 1, 0 }
  0x32   : > { %s3021_s9 = scalar_select %p2390_p3, 1, 0 }
  0x33   : > { %3020 = sst [smem:[#allocation44_spill]] %s3019_s17  ;;  %s2396_s29 = sand.u32 1, %s2184_s22  }
  0x34   : > { %3022 = sst [smem:[#allocation45_spill]] %s3021_s9  ;;  %s2956_s11 = sand.u32 1, %s2204_s27  }
  0x35   : > { %s1475_s15 = sshll.u32 %s2396_s29, 2  ;;  %p2402_p0 = pnand %p1704_p9, %p2350_p5 }
  0x36   : > { %s1476_s16 = sshll.u32 %s2200_s26, 6  ;;  %s3024_s2 = sld [smem:[#allocation52_spill]] }
  0x37   : > { %s3023_s10 = scalar_select %p2402_p0, 1, 0 }
  0x38   : > { %s393_s9 = scalar_lea.vmem [#allocation8], %s1475_s15  ;;  %p2414_p2 = pnand %p1704_p9, %p2362_p8 }
  0x39   : > { %s400_s1 = sshll.u32 %s393_s9, 4  ;;  %s2422_s8 = scalar_lea.sflag [#allocation9], %s2956_s11  ;;  %s2418_s1 = int_to_ptr.vmem [resolvable:$true] %s400_s1 }
  0x3a   : > { %s3025_s30 = scalar_select %p2414_p2, 1, 0 }
  0x3b   : > { %p2428_p5 = pneg %p2402_p0 }
  0x3c   : > { %s2410_s20 = scalar_lea.hbm %s3024_s2, %s1476_s16  ;;  %s1833_s13 = scalar_lea.hbm %s3024_s2, 128 }
  0x3d   : > { %s1828_s6 = scalar_lea.hbm %s2410_s20, 64  ;;  %p1834_p8 = scmp.lt.u32.totalorder %s2410_s20, %s3024_s2 }
  0x3e   : > { %p1829_p4 = scmp.ne.s32.totalorder %s2410_s20, %s1828_s6  ;;  %p1835_p9 = scmp.lt.u32.totalorder %s1833_s13, %s1828_s6 }
  0x3f   : > { %p1837_p3 = scmp.lt.u32.totalorder %s1828_s6, %s2410_s20 }
  0x40   : > { %p1831_p6 = pnand %p2428_p5, %p1829_p4  ;;  %p1836_p11 = por %p1835_p9, %p1834_p8 }
  0x42   : > { %p1832_p10 = pneg %p1831_p6  ;;  %p1838_p1 = por %p1837_p3, %p1836_p11 }
  0x44   : > { %p1839_p12 = pnand %p1838_p1, %p1832_p10 }
  0x46   : > { %1842 = shalt.err (!%p1839_p12)
}
  0x47   : > { %s1843_s11 = scalar_lea.vmem %s2418_s1, 64  ;;  %s2206_s9 = smov [#allocation8]  }
  0x48   : > { %p1844_p4 = scmp.ne.s32.totalorder %s2418_s1, %s1843_s11  ;;  %s1848_s17 = sshll.u32 %s2206_s9, 4  ;;  %s1849_s17 = int_to_ptr.vmem [resolvable:$false] %s1848_s17 }
  0x49   : > { %s1850_s15 = scalar_lea.vmem %s1849_s17, 128  ;;  %p1851_p7 = scmp.lt.s32.totalorder %s2418_s1, %s1849_s17 }
  0x4a   : > { %p1846_p6 = pnand %p1844_p4, %p2428_p5  ;;  %p1852_p2 = scmp.lt.s32.totalorder %s1850_s15, %s1843_s11 }
  0x4c   : > { %p1847_p13 = pneg %p1846_p6  ;;  %p1853_p8 = por %p1852_p2, %p1851_p7 }
  0x4e   : > { %p1854_p9 = pnand %p1853_p8, %p1847_p13 }
  0x50   : > { %1857 = shalt.err (!%p1854_p9)
}
  0x51   : > { %1684 = dma.hbm_to_vmem [thread:$0]  (!%p2402_p0), %s2410_s20, 64, %s2418_s1, %s2422_s8  }
  0x52   : > { %p1486_p12 = scmp.ge.s32.totalorder %s2204_s27, 1  ;;  %p492_p1 = scmp.lt.s32.totalorder %s2204_s27, 7 }
  0x53   : > { %s2962_s6 = sshll.u32 %s2396_s29, 6  ;;  %s2963_s13 = sshll.u32 %s2200_s26, 10 }
  0x54   : > { %p2455_p7 = pnand %p1486_p12, %p492_p1  ;;  %s444_s16 = scalar_lea.vmem [#allocation11], %s2962_s6 }
  0x55   : > { %s451_s9 = sshll.u32 %s444_s16, 4  ;;  %s3028_s5 = sld [smem:[#allocation55_spill]]  ;;  %s2469_s9 = int_to_ptr.vmem [resolvable:$true] %s451_s9 }
  0x56   : > { %s3027_s11 = scalar_select %p2455_p7, 1, 0 }
  0x57   : > { %s3029_s1 = sand.u32 1, %s2204_s27  }
  0x58   : > { %s2473_s20 = scalar_lea.sflag [#allocation12], %s3029_s1 }
  0x5b   : > { %s2467_s2 = scalar_lea.hbm %s3028_s5, %s2963_s13  ;;  %s1863_s17 = scalar_lea.hbm %s3028_s5, 2048 }
  0x5c   : > { %s1858_s23 = scalar_lea.hbm %s2467_s2, 1024  ;;  %p1864_p10 = scmp.lt.u32.totalorder %s2467_s2, %s3028_s5 }
  0x5d   : > { %p1859_p13 = scmp.ne.s32.totalorder %s2467_s2, %s1858_s23  ;;  %p1865_p11 = scmp.lt.u32.totalorder %s1863_s17, %s1858_s23 }
  0x5e   : > { %p1867_p6 = scmp.lt.u32.totalorder %s1858_s23, %s2467_s2 }
  0x5f   : > { %p1861_p3 = pnand %p1859_p13, %p2428_p5  ;;  %p1866_p4 = por %p1865_p11, %p1864_p10 }
  0x61   : > { %p1862_p2 = pneg %p1861_p3  ;;  %p1868_p8 = por %p1867_p6, %p1866_p4 }
  0x63   : > { %p1869_p9 = pnand %p1868_p8, %p1862_p2 }
  0x65   : > { %1872 = shalt.err (!%p1869_p9)
}
  0x66   : > { %s1873_s1 = scalar_lea.vmem %s2469_s9, 1024  ;;  %s2207_s6 = smov [#allocation11]  }
  0x67   : > { %p1874_p12 = scmp.ne.s32.totalorder %s2469_s9, %s1873_s1  ;;  %s1878_s16 = sshll.u32 %s2207_s6, 4  ;;  %s1879_s16 = int_to_ptr.vmem [resolvable:$false] %s1878_s16 }
  0x68   : > { %s1880_s13 = scalar_lea.vmem %s1879_s16, 2048  ;;  %p1881_p3 = scmp.lt.s32.totalorder %s2469_s9, %s1879_s16 }
  0x69   : > { %p1876_p1 = pnand %p1874_p12, %p2428_p5  ;;  %p1882_p7 = scmp.lt.s32.totalorder %s1880_s13, %s1873_s1 }
  0x6b   : > { %p1877_p13 = pneg %p1876_p1  ;;  %p1883_p10 = por %p1882_p7, %p1881_p3 }
  0x6d   : > { %p1884_p11 = pnand %p1883_p10, %p1877_p13 }
  0x6f   : > { %1887 = shalt.err (!%p1884_p11)
}
  0x70   : > { %s2974_s23 = smov 64   ;;  %s2976_s17 = smov 4  }
  0x71   : > { %1690 = dma.hbm_to_vmem [thread:$0]  (!%p2402_p0), %s2467_s2, 1024, %s2469_s9, %s2473_s20, %s2974_s23, %s2974_s23, %s2976_s17  }
  0x72   : > { %s3030_s1 = sshll.u32 %s2200_s26, 10  ;;  %s3031_s7 = sld [smem:[#allocation57_spill]] }
  0x73   : > { %s3032_s5 = sshll.u32 %s2396_s29, 6  ;;  %s1472_s14 = sshll.u32 %s2396_s29, 3 }
  0x74   : > { %s2510_s27 = scalar_lea.vmem [#allocation13], %s3032_s5  ;;  %s1541_s18 = sshll.u32 %s2200_s26, 7 }
  0x75   : > { %s478_s24 = sshll.u32 %s2510_s27, 4  ;;  %s3033_s0 = sld [smem:[#allocation50_spill]]  ;;  %s2551_s24 = int_to_ptr.vmem [resolvable:$true] %s478_s24 }
  0x76   : > { %s372_s2 = scalar_lea.vmem [#allocation5], %s1472_s14 }
  0x77   : > { %s379_s9 = sshll.u32 %s372_s2, 4  ;;  %s2520_s9 = int_to_ptr.vmem [resolvable:$true] %s379_s9 }
  0x78   : > { %s2506_s13 = scalar_lea.hbm %s3031_s7, %s3030_s1  ;;  %s369_s1 = scalar_lea.sflag [#allocation6], %s2396_s29 }
  0x7b   : > { %s2518_s21 = scalar_lea.hbm %s3033_s0, %s1541_s18  ;;  %s1893_s28 = scalar_lea.hbm %s3033_s0, 256 }
  0x7c   : > { %s1888_s5 = scalar_lea.hbm %s2518_s21, 128  ;;  %p1894_p6 = scmp.lt.u32.totalorder %s2518_s21, %s3033_s0 }
  0x7d   : > { %p1889_p7 = scmp.ne.s32.totalorder %s2518_s21, %s1888_s5  ;;  %p1895_p8 = scmp.lt.u32.totalorder %s1893_s28, %s1888_s5 }
  0x7e   : > { %p1897_p12 = scmp.lt.u32.totalorder %s1888_s5, %s2518_s21 }
  0x7f   : > { %p1891_p2 = pnand %p1889_p7, %p2428_p5  ;;  %p1896_p9 = por %p1895_p8, %p1894_p6 }
  0x81   : > { %p1892_p4 = pneg %p1891_p2  ;;  %p1898_p1 = por %p1897_p12, %p1896_p9 }
  0x83   : > { %p1899_p13 = pnand %p1898_p1, %p1892_p4 }
  0x85   : > { %1902 = shalt.err (!%p1899_p13)
}
  0x86   : > { %s1903_s14 = scalar_lea.vmem %s2520_s9, 128  ;;  %s2210_s2 = smov [#allocation5]  }
  0x87   : > { %p1904_p3 = scmp.ne.s32.totalorder %s2520_s9, %s1903_s14  ;;  %s1908_s6 = sshll.u32 %s2210_s2, 4  ;;  %s1909_s6 = int_to_ptr.vmem [resolvable:$false] %s1908_s6 }
  0x88   : > { %s1910_s16 = scalar_lea.vmem %s1909_s6, 256  ;;  %p1911_p7 = scmp.lt.s32.totalorder %s2520_s9, %s1909_s6 }
  0x89   : > { %p1906_p10 = pnand %p1904_p3, %p2428_p5  ;;  %p1912_p2 = scmp.lt.s32.totalorder %s1910_s16, %s1903_s14 }
  0x8b   : > { %p1907_p11 = pneg %p1906_p10  ;;  %p1913_p6 = por %p1912_p2, %p1911_p7 }
  0x8d   : > { %p1914_p8 = pnand %p1913_p6, %p1907_p11 }
  0x8f   : > { %1917 = shalt.err (!%p1914_p8)
}
  0x90   : > { %1681 = dma.hbm_to_vmem [thread:$0]  (!%p2402_p0), %s2518_s21, 128, %s2520_s9, %s369_s1, %s2974_s23, %s2974_s23, %s2976_s17  }
  0x91   : > { %s52_s5 = sadd.s32 1, %s2196_s25  ;;  %s56_s28 = sadd.s32 1, %s2200_s26 }
  0x92   : > { %p54_p4 = scmp.ge.s32.totalorder %s52_s5, 3  ;;  %s409_s29 = sand.u32 1, %s2172_s19  }
  0x93   : > { %s117_s18 = sadd.s32 1, %s2172_s19  ;;  %s1477_s12 = sshll.u32 %s409_s29, 6 }
  0x94   : > { %s3092_s5 = smov (%p54_p4, %s52_s5), 0  ;;  %s3094_s28 = smov (!%p54_p4, %s56_s28), %s2200_s26 }
  0x95   : > { %3034 = sst [smem:[#allocation46_spill]] %s3092_s5  ;;  %s1478_s14 = sshll.u32 %s2196_s25, 4 }
  0x96   : > { %p58_p9 = scmp.ge.s32.totalorder %s3094_s28, 2  ;;  %s1657_s21 = smul.u32 48, %s2200_s26 }
  0x97   : > { %s113_s27 = ssub.s32 %s2196_s25, %s3092_s5  ;;  %s411_s9 = scalar_lea.vmem [#allocation10], %s1477_s12 }
  0x98   : > { %s420_s1 = sshll.u32 %s411_s9, 4  ;;  %s3096_s28 = smov (%p58_p9, %s3094_s28), 0  ;;  %s2566_s1 = int_to_ptr.vmem [resolvable:$true] %s420_s1 }
  0x99   : > { %3035 = sst [smem:[#allocation47_spill]] %s3096_s28  ;;  %s417_s2 = sadd.s32 %s1657_s21, %s1478_s14 }
  0x9a   : > { %s60_s6 = ssub.s32 %s2200_s26, %s3096_s28  ;;  %s1479_s16 = sshll.u32 %s417_s2, 6 }
  0x9b   : > { %p61_p12 = scmp.eq.s32.totalorder %s60_s6, 0  ;;  %s114_s29 = sor.u32 %s113_s27, %s60_s6 }
  0x9c   : > { %p115_p1 = scmp.eq.s32.totalorder %s114_s29, 0  ;;  %s3036_s3 = sld [smem:[#allocation53_spill]] }
  0x9d   : > { %s3037_s0 = sadd.s32 1, %s2184_s22  ;;  %p3040_p3 = scmp.ne.s32.totalorder %s3025_s30, 0 }
  0x9e   : > { %s2578_s12 = scalar_select %p61_p12, %s2184_s22, %s3037_s0  }
  0x9f   : > { %s2581_s14 = scalar_select %p115_p1, %s2172_s19, %s117_s18  }
  0xa0   : > { %3038 = sst [smem:[#allocation48_spill]] %s2578_s12  ;;  %p1920_p10 = pneg %p3040_p3 }
  0xa1   : > { %3039 = sst [smem:[#allocation49_spill]] %s2581_s14 }
  0xa2   : > { %s2573_s15 = scalar_lea.hbm %s3036_s3, %s1479_s16  ;;  %s1923_s27 = scalar_lea.hbm %s3036_s3, 6144 }
  0xa3   : > { %s1918_s21 = scalar_lea.hbm %s2573_s15, 1024  ;;  %p1924_p2 = scmp.lt.u32.totalorder %s2573_s15, %s3036_s3 }
  0xa4   : > { %p1919_p13 = scmp.ne.s32.totalorder %s2573_s15, %s1918_s21  ;;  %p1925_p6 = scmp.lt.u32.totalorder %s1923_s27, %s1918_s21 }
  0xa5   : > { %p1927_p4 = scmp.lt.u32.totalorder %s1918_s21, %s2573_s15 }
  0xa6   : > { %p1921_p11 = pnand %p1920_p10, %p1919_p13  ;;  %p1926_p8 = por %p1925_p6, %p1924_p2 }
  0xa8   : > { %p1922_p7 = pneg %p1921_p11  ;;  %p1928_p9 = por %p1927_p4, %p1926_p8 }
  0xaa   : > { %p1929_p12 = pnand %p1928_p9, %p1922_p7 }
  0xac   : > { %1932 = shalt.err (!%p1929_p12)
}
  0xad   : > { %s1933_s0 = scalar_lea.vmem %s2566_s1, 1024  ;;  %s2211_s18 = smov [#allocation10]  }
  0xae   : > { %p1934_p1 = scmp.ne.s32.totalorder %s2566_s1, %s1933_s0  ;;  %s1938_s6 = sshll.u32 %s2211_s18, 4  ;;  %s1939_s6 = int_to_ptr.vmem [resolvable:$false] %s1938_s6 }
  0xaf   : > { %s1940_s16 = scalar_lea.vmem %s1939_s6, 2048  ;;  %p1941_p0 = scmp.lt.s32.totalorder %s2566_s1, %s1939_s6 }
  0xb0   : > { %p1936_p13 = pnand %p1934_p1, %p1920_p10  ;;  %p1942_p2 = scmp.lt.s32.totalorder %s1940_s16, %s1933_s0 }
  0xb2   : > { %p1937_p11 = pneg %p1936_p13  ;;  %p1943_p6 = por %p1942_p2, %p1941_p0 }
  0xb4   : > { %p1944_p8 = pnand %p1943_p6, %p1937_p11 }
  0xb6   : > { %1947 = shalt.err (!%p1944_p8)
}
  0xb7   : > { %s3041_s29 = smov 4   ;;  %s3042_s21 = smov 64  }
  0xb8   : > { %1687 = dma.hbm_to_vmem [thread:$0]  (!%p3040_p3), %s2573_s15, 1024, %s2566_s1, %s2422_s8, %s3042_s21, %s3042_s21, %s3041_s29  }
  0xb9   : > { %s1948_s23 = scalar_lea.hbm %s2506_s13, 1024  ;;  %s1953_s30 = scalar_lea.hbm %s3031_s7, 2048 }
  0xba   : > { %p1949_p10 = scmp.ne.s32.totalorder %s2506_s13, %s1948_s23  ;;  %p1954_p4 = scmp.lt.u32.totalorder %s2506_s13, %s3031_s7 }
  0xbb   : > { %p1955_p9 = scmp.lt.u32.totalorder %s1953_s30, %s1948_s23  ;;  %p1957_p1 = scmp.lt.u32.totalorder %s1948_s23, %s2506_s13 }
  0xbc   : > { %p1951_p0 = pnand %p1949_p10, %p2428_p5 }
  0xbd   : > { %p1956_p12 = por %p1955_p9, %p1954_p4 }
  0xbe   : > { %p1952_p7 = pneg %p1951_p0 }
  0xbf   : > { %p1958_p13 = por %p1957_p1, %p1956_p12 }
  0xc1   : > { %p1959_p11 = pnand %p1958_p13, %p1952_p7 }
  0xc3   : > { %1962 = shalt.err (!%p1959_p11)
}
  0xc4   : > { %s1963_s8 = scalar_lea.vmem %s2551_s24, 1024  ;;  %s2212_s15 = smov [#allocation13]  }
  0xc5   : > { %p1964_p3 = scmp.ne.s32.totalorder %s2551_s24, %s1963_s8  ;;  %s1968_s1 = sshll.u32 %s2212_s15, 4  ;;  %s1969_s1 = int_to_ptr.vmem [resolvable:$false] %s1968_s1 }
  0xc6   : > { %s1970_s0 = scalar_lea.vmem %s1969_s1, 2048  ;;  %p1971_p8 = scmp.lt.s32.totalorder %s2551_s24, %s1969_s1 }
  0xc7   : > { %p1966_p2 = pnand %p1964_p3, %p2428_p5  ;;  %p1972_p10 = scmp.lt.s32.totalorder %s1970_s0, %s1963_s8 }
  0xc9   : > { %p1967_p6 = pneg %p1966_p2  ;;  %p1973_p0 = por %p1972_p10, %p1971_p8 }
  0xcb   : > { %p1974_p4 = pnand %p1973_p0, %p1967_p6 }
  0xcd   : > { %1977 = shalt.err (!%p1974_p4)
}
  0xce   : > { %p3043_p7 = scmp.ne.s32.totalorder %s3023_s10, 0  ;;  %p3044_p5 = scmp.ne.s32.totalorder %s3027_s11, 0 }
  0xcf   : > { %s3045_s4 = sld [smem:[#allocation32_spill]] (!%p3044_p5)  ;;  %s3046_s18 = sld [smem:[#allocation40_spill]] (!%p3044_p5) }
  0xd0   : > { %1693 = dma.hbm_to_vmem [thread:$0]  (!%p3043_p7), %s2506_s13, 1024, %s2551_s24, %s2473_s20, %s3042_s21, %s3042_s21, %s3041_s29  }
  0xd1   : > { %496 = sbr.rel (%p3044_p5) target bundleno = 1490 (0x5d2), region = 52 }
  0xd5   : > { %s2640_s6 = sand.u32 (!%p3044_p5), 1, %s3045_s4   ;;  %p3047_p9 = scmp.ne.s32.totalorder (!%p3044_p5), %s3046_s18, 0 }
  0xd6   : > { %s2643_s16 = sshll.u32 (!%p3044_p5), %s2640_s6, 3  ;;  %s499_s10 = scalar_lea.sflag (!%p3044_p5), [#allocation6], %s2640_s6 }
  0xd8   : > { %2135 = dma.done.wait (%p3047_p9), %s499_s10, 128  }
  0xd9   : > { %2137 = vsyncadd (%p3047_p9), %s499_s10, 4294967168  ;;  %s3048_s24 = sld [smem:[#allocation39_spill]]  ;;  %s1488_s20 = sshll.u32 %s2640_s6, 2 }
  0xda   : > { %s2656_s29 = scalar_lea.vmem [#allocation8], %s1488_s20 }
  0xdf   : > { %s2652_s11 = sand.u32 1, %s3048_s24  }
  0xe0   : > { %s508_s13 = scalar_lea.sflag [#allocation9], %s2652_s11 }
  0xe1   : > { %2139 = dma.done.wait (%p3047_p9), %s508_s13, 64  }
  0xe2   : > { %2141 = vsyncadd (%p3047_p9), %s508_s13, 4294967232  ;;  %s3049_s21 = sld [smem:[#allocation30_spill]] }
  0xe3   : > { %s3050_s17 = sld [smem:[#allocation41_spill]] }
  0xe8   : > { %s2663_s27 = sand.u32 1, %s3049_s21  }
  0xe9   : > { %s1489_s30 = sshll.u32 %s2663_s27, 6  ;;  %p3051_p12 = scmp.ne.s32.totalorder %s3050_s17, 0 }
  0xea   : > { %s2666_s9 = scalar_lea.vmem [#allocation10], %s1489_s30 }
  0xeb   : > { %2143 = dma.done.wait (%p3051_p12), %s508_s13, 1024  }
  0xec   : > { %2145 = vsyncadd (%p3051_p12), %s508_s13, 4294966272  ;;  %s2979_s2 = sshll.u32 %s2640_s6, 6  ;;  %s526_s8 = scalar_lea.sflag [#allocation12], %s2652_s11 }
  0xed   : > { %s2676_s15 = scalar_lea.vmem [#allocation11], %s2979_s2 }
  0xee   : > { %2147 = dma.done.wait (%p3047_p9), %s526_s8, 2048  }
  0xef   : > { %2149 = vsyncadd (%p3047_p9), %s526_s8, 4294965248  ;;  %s3052_s1 = sld [smem:[#allocation35_spill]]  ;;  %s3053_s0 = sld [smem:[#allocation34_spill]] }
  0xf0   : > { %s3054_s21 = sld [smem:[#allocation56_spill]]  ;;  %s3055_s23 = sld [smem:[#allocation58_spill]] }
  0xf1   : > { %s3056_s5 = sld [smem:[#allocation51_spill]]  ;;  %s3057_s22 = sld [smem:[#allocation54_spill]] }
  0xf2   : > { %s2213_s20 = smov [#allocation2]  }
  0xf3   : > { %s649_s13 = sshll.u32 %s2213_s20, 4  ;;  %s650_s13 = int_to_ptr.vmem [resolvable:$true] %s649_s13 }
  0xf5   : > { %p618_p1 = scmp.lt.s32.totalorder %s3052_s1, 1  ;;  %p620_p13 = scmp.lt.s32.totalorder %s3053_s0, 2 }
  0xf6   : > { %p633_p11 = scmp.eq.s32.totalorder %s3053_s0, 0  ;;  %s2700_s4 = sshll.u32 %s3052_s1, 7 }
  0xf7   : > { %s2687_s10 = scalar_select %p618_p1, %s3052_s1, 1 }
  0xf8   : > { %s621_s24 = scalar_select %p620_p13, %s3053_s0, 2 }
  0xf9   : > { %s1658_s18 = smul.u32 3, %s2687_s10  ;;  %s627_s17 = scalar_lea.vmem %s3054_s21, %s2687_s10 }
  0xfa   : > { %s630_s2 = scalar_lea.vmem %s3055_s23, %s2687_s10  ;;  %s641_s26 = scalar_lea.hbm %s3056_s5, %s2700_s4 }
  0xfb   : > { %s2702_s3 = sadd.s32 %s1658_s18, %s621_s24  ;;  %s1978_s21 = scalar_lea.hbm %s641_s26, 128 }
  0xfc   : > { %s624_s19 = scalar_lea.vmem %s3057_s22, %s2702_s3  ;;  %p1979_p3 = scmp.ne.s32.totalorder %s641_s26, %s1978_s21 }
  0xfd   : > { %s1982_s24 = scalar_lea.hbm %s3056_s5, 256  ;;  %p1983_p8 = scmp.lt.u32.totalorder %s641_s26, %s3056_s5 }
  0xfe   : > { %p1980_p2 = pnand %p1979_p3, %p633_p11  ;;  %p1984_p10 = scmp.lt.u32.totalorder %s1982_s24, %s1978_s21 }
  0xff   : > { %p1986_p4 = scmp.lt.u32.totalorder %s1978_s21, %s641_s26 }
 0x100   : > { %p1981_p6 = pneg %p1980_p2  ;;  %p1985_p0 = por %p1984_p10, %p1983_p8 }
 0x102   : > { %p1987_p7 = por %p1986_p4, %p1985_p0 }
 0x104   : > { %p1988_p5 = pnand %p1987_p7, %p1981_p6 }
 0x106   : > { %1991 = shalt.err (!%p1988_p5)  }
 0x107   : > { %s1992_s22 = scalar_lea.vmem %s650_s13, 128  ;;  %p1999_p13 = scmp.lt.s32.totalorder %s650_s13, %s650_s13 }
 0x108   : > { %p1993_p9 = scmp.ne.s32.totalorder %s650_s13, %s1992_s22  ;;  %p2000_p3 = scmp.lt.s32.totalorder %s1992_s22, %s1992_s22 }
 0x10a   : > { %p1994_p12 = pnand %p1993_p9, %p633_p11  ;;  %p2001_p2 = por %p2000_p3, %p1999_p13 }
 0x10c   : > { %p1995_p1 = pneg %p1994_p12 }
 0x10e   : > { %p2002_p8 = pnand %p2001_p2, %p1995_p1 }
 0x110   : > { %2005 = shalt.err (!%p2002_p8)  }
 0x111   : > { %1670 = dma.hbm_to_vmem [thread:$0]  (%p633_p11), %s641_s26, 128, %s650_s13, [#allocation4] }
 0x112   : > { %s3059_s25 = sshll.u32 %s2640_s6, 6  ;;  %s3060_s12 = sshll.u32 %s2663_s27, 3 }
 0x113   : > { %s2726_s28 = scalar_lea.vmem [#allocation13], %s3059_s25  ;;  %s2730_s30 = scalar_lea.vmem [#allocation14], %s3060_s12 }
 0x114   : > { %s610_s8 = scalar_lea.vmem [#allocation15], %s2643_s16  ;;  %s617_s20 = scalar_lea.vmem [#allocation17], %s2643_s16 }
 0x115   : > { %2151 = dma.done.wait (%p633_p11), [#allocation4], 128 }
 0x116   : > { %2153 = vsyncadd (%p633_p11), [#allocation4], 4294967168  ;;  %v2214_v0 = vmov 0.0   ;;  %vm2215_vm0 = vmmov 0   ;;  %v1803_v1 = vld [vmem:[%s2666_s9] sm:$0xff]   ;;  %v1804_v2 = vld [vmem:[%s2666_s9 + $0x8] sm:$0xff]  }
 0x117   : > { %1585 = vmatprep.subr.bf16.mxu0 %v2214_v0  ;;  %1601 = vmatprep.mubr.msk.bf16.mxu0 %vm2215_vm0, %v2214_v0  ;;  %v1805_v3 = vld [vmem:[%s2666_s9 + $0x10] sm:$0xff]   ;;  %v1806_v4 = vld [vmem:[%s2666_s9 + $0x18] sm:$0xff]   ;;  %v1807_v5 = vld [vmem:[%s2666_s9 + $0x20] sm:$0xff]   ;;  %s3061_s26 = scalar_lea.vmem [#allocation5], %s2643_s16  ;;  %vm788_vm1 = vcmask 130048   ;;  %p850_p11 = scmp.eq.s32.totalorder %s3053_s0, 2 }
 0x118   : > { %1605 = vmatprep.subr.bf16.mxu1 %v2214_v0  ;;  %1607 = vmatprep.mubr.msk.bf16.mxu1 %vm2215_vm0, %v2214_v0  ;;  %v1808_v6 = vld [vmem:[%s2666_s9 + $0x28] sm:$0xff]   ;;  %v1809_v7 = vld [vmem:[%s2666_s9 + $0x30] sm:$0xff]   ;;  %v1810_v8 = vld [vmem:[%s2666_s9 + $0x38] sm:$0xff]   ;;  %v2216_v28 = vmov (%p850_p11), 0.0   ;;  %vm2217_vm2 = vmmov (%p850_p11), 0  }
 0x119   : > { %1586 = vmatpush3.bf16.msra.mxu0 %v1803_v1  ;;  %v660_v9 = vld [vmem:[#allocation2] sm:$0xff]  ;;  %v1811_v15 = vld [vmem:[%s3061_s26] sm:$0xff]   ;;  %v855_v29 = vld [vmem:[%s2656_s29] sm:$0xf] (%p850_p11) }
 0x11a   : > { %1587 = vmatprep.subr.bf16.mxu0 %v2214_v0  ;;  %v1506_v16 = vld [vmem:[%s624_s19] ss:$0 sm:$0xff]  ;;  %v1813_v30 = vld [vmem:[%s2676_s15 + $0x8] sm:$0xff] (%p850_p11)   ;;  %v1814_v31 = vld [vmem:[%s2676_s15 + $0x10] sm:$0xff] (%p850_p11)  }
 0x11b   : > { %v1812_v27 = vld [vmem:[%s2676_s15] sm:$0xff] (%p850_p11)   ;;  %v1815_v32 = vld [vmem:[%s2676_s15 + $0x18] sm:$0xff] (%p850_p11)   ;;  %v1817_v34 = vld [vmem:[%s2676_s15 + $0x28] sm:$0xff] (%p850_p11)  }
 0x11c   : > { %v1816_v33 = vld [vmem:[%s2676_s15 + $0x20] sm:$0xff] (%p850_p11)   ;;  %v1818_v35 = vld [vmem:[%s2676_s15 + $0x30] sm:$0xff] (%p850_p11)   ;;  %v1819_v36 = vld [vmem:[%s2676_s15 + $0x38] sm:$0xff] (%p850_p11)  }
 0x11d   : > { %1588 = vmatpush3.bf16.msra.mxu0 %v1804_v2  ;;  %v1820_v37 = vld [vmem:[%s2726_s28] sm:$0xff] (%p850_p11)   ;;  %v1821_v38 = vld [vmem:[%s2726_s28 + $0x8] sm:$0xff] (%p850_p11)   ;;  %v1822_v39 = vld [vmem:[%s2726_s28 + $0x10] sm:$0xff] (%p850_p11)  }
 0x11e   : > { %1589 = vmatprep.subr.bf16.mxu0 %v2214_v0  ;;  %v1823_v40 = vld [vmem:[%s2726_s28 + $0x18] sm:$0xff] (%p850_p11)   ;;  %v1824_v41 = vld [vmem:[%s2726_s28 + $0x20] sm:$0xff] (%p850_p11)   ;;  %v1825_v42 = vld [vmem:[%s2726_s28 + $0x28] sm:$0xff] (%p850_p11)  }
 0x11f   : > { %v1826_v48 = vld [vmem:[%s2726_s28 + $0x30] sm:$0xff] (%p850_p11)   ;;  %v1827_v49 = vld [vmem:[%s2726_s28 + $0x38] sm:$0xff] (%p850_p11)   ;;  %v1513_v50 = vld [vmem:[%s627_s17] ss:$0 sm:$0xff] (%p850_p11) }
 0x120   : > { %v1522_v58 = vld [vmem:[%s630_s2] ss:$0 sm:$0xff] (%p850_p11) }
 0x121   : > { %1590 = vmatpush3.bf16.msra.mxu0 %v1805_v3 }
 0x122   : > { %1591 = vmatprep.subr.bf16.mxu0 %v2214_v0 }
 0x125   : > { %1592 = vmatpush3.bf16.msra.mxu0 %v1806_v4 }
 0x126   : > { %1593 = vmatprep.subr.bf16.mxu0 %v2214_v0 }
 0x129   : > { %1594 = vmatpush3.bf16.msra.mxu0 %v1807_v5 }
 0x12a   : > { %1595 = vmatprep.subr.bf16.mxu0 %v2214_v0 }
 0x12d   : > { %1596 = vmatpush3.bf16.msra.mxu0 %v1808_v6 }
 0x12e   : > { %1597 = vmatprep.subr.bf16.mxu0 %v2214_v0 }
 0x131   : > { %1598 = vmatpush3.bf16.msra.mxu0 %v1809_v7 }
 0x132   : > { %1599 = vmatprep.subr.bf16.mxu0 %v2214_v0 }
 0x135   : > { %1600 = vmatpush3.bf16.msra.mxu0 %v1810_v8 }
 0x136   : > { %1611 = vmatprep.subr.bf16.mxu0 (%p850_p11), %v2216_v28 }
 0x138   : > { %1602 = vmatmul.mubr.bf16.vlgmr.msra.gmra.mrb[0].mxu0 %v660_v9 }
 0x139   : > { %1613 = vmatprep.mubr.msk.bf16.mxu0 (%p850_p11), %vm2217_vm2, %v2216_v28 }
 0x20b   : > { %v759_v10 = vpop.f32.mrb[0].mxu0 }
 0x20c   : > { %v1603_v11 = vpop.f32.mrb[1].mxu0 }
 0x20d   : > { %v762_v12 = vpop.f32.mrb[2].mxu0 }
 0x20e   : > { %v766_v13 = vpack.c.bf16 %v762_v12, %v759_v10  ;;  %v1604_v14 = vpop.f32.mrb[3].mxu0 }
 0x210   : > { %1606 = vmatpush3.bf16.msra.mxu1 %v766_v13 }
 0x211   : > { %1617 = vmatprep.subr.bf16.mxu1 (%p850_p11), %v2216_v28 }
 0x213   : > { %1608 = vmatmul.mubr.msk.bf16.vlgmr.msra.gmra.mrb[0].mxu1 %vm788_vm1, %v1811_v15 }
 0x214   : > { %1618 = vmatpush3.bf16.msra.mxu1 (%p850_p11), %v1812_v27  ;;  %1633 = vmatprep.mubr.msk.bf16.mxu1 (%p850_p11), %vm2217_vm2, %v2216_v28 }
 0x215   : > { %1619 = vmatprep.subr.bf16.mxu1 (%p850_p11), %v2216_v28 }
 0x218   : > { %1620 = vmatpush3.bf16.msra.mxu1 (%p850_p11), %v1813_v30 }
 0x219   : > { %1621 = vmatprep.subr.bf16.mxu1 (%p850_p11), %v2216_v28 }
 0x21c   : > { %1622 = vmatpush3.bf16.msra.mxu1 (%p850_p11), %v1814_v31 }
 0x21d   : > { %1623 = vmatprep.subr.bf16.mxu1 (%p850_p11), %v2216_v28 }
 0x220   : > { %1624 = vmatpush3.bf16.msra.mxu1 (%p850_p11), %v1815_v32 }
 0x221   : > { %1625 = vmatprep.subr.bf16.mxu1 (%p850_p11), %v2216_v28 }
 0x224   : > { %1626 = vmatpush3.bf16.msra.mxu1 (%p850_p11), %v1816_v33 }
 0x225   : > { %1627 = vmatprep.subr.bf16.mxu1 (%p850_p11), %v2216_v28 }
 0x228   : > { %1628 = vmatpush3.bf16.msra.mxu1 (%p850_p11), %v1817_v34 }
 0x229   : > { %1629 = vmatprep.subr.bf16.mxu1 (%p850_p11), %v2216_v28 }
 0x22c   : > { %1630 = vmatpush3.bf16.msra.mxu1 (%p850_p11), %v1818_v35 }
 0x22d   : > { %1631 = vmatprep.subr.bf16.mxu1 (%p850_p11), %v2216_v28 }
 0x230   : > { %1632 = vmatpush3.bf16.msra.mxu1 (%p850_p11), %v1819_v36 }
 0x2e6   : > { %v826_v17 = vpop.f32.mrb[0].mxu1 }
 0x2e7   : > { %v827_v18 = vadd.f32 %v1506_v16, %v826_v17  ;;  %v1609_v19 = vpop.f32.mrb[1].mxu1 }
 0x2e8   : > { %v829_v20 = vpop.f32.mrb[2].mxu1 }
 0x2e9   : > { %v830_v21 = vadd.f32 %v1506_v16, %v829_v20  ;;  %v1610_v22 = vpop.f32.mrb[3].mxu1  ;;  %v833_v23 = vmax.f32 %v827_v18, 0.0  ;;  %854 = sbr.rel (!%p850_p11) target bundleno = 1409 (0x581), region = 88 }
 0x2eb   : > { %v834_v24 = vmax.f32 %v830_v21, 0.0 }
 0x2ed   : > { %v835_v25 = vpack.c.bf16 %v834_v24, %v833_v23 }
 0x2ef   : > { %1553 = vst [vmem:[%s2730_s30] sm:$0xff] %v835_v25   ;;  %849 = vst [vmem:[#allocation2] sm:$0xff] %v835_v25 }
 0x2f6   : > { %v856_v26 = vld [vmem:[#allocation2] sm:$0xff] }
 0x2f7   : > { %1612 = vmatpush3.bf16.msra.mxu0 %v856_v26 }
 0x2f8   : > { %1637 = vmatprep.subr.bf16.mxu0 %v2216_v28 }
 0x2fa   : > { %1614 = vmatmul.mubr.msk.bf16.vlgmr.msra.gmra.mrb[0].mxu0 %vm788_vm1, %v855_v29 }
 0x2fb   : > { %1653 = vmatprep.mubr.msk.bf16.mxu0 %vm2217_vm2, %v2216_v28  ;;  %1638 = vmatpush3.bf16.msra.mxu0 %v1820_v37 }
 0x2fc   : > { %1639 = vmatprep.subr.bf16.mxu0 %v2216_v28 }
 0x2ff   : > { %1640 = vmatpush3.bf16.msra.mxu0 %v1821_v38 }
 0x300   : > { %1641 = vmatprep.subr.bf16.mxu0 %v2216_v28 }
 0x303   : > { %1642 = vmatpush3.bf16.msra.mxu0 %v1822_v39 }
 0x304   : > { %1643 = vmatprep.subr.bf16.mxu0 %v2216_v28 }
 0x307   : > { %1644 = vmatpush3.bf16.msra.mxu0 %v1823_v40 }
 0x308   : > { %1645 = vmatprep.subr.bf16.mxu0 %v2216_v28 }
 0x30b   : > { %1646 = vmatpush3.bf16.msra.mxu0 %v1824_v41 }
 0x30c   : > { %1647 = vmatprep.subr.bf16.mxu0 %v2216_v28 }
 0x30f   : > { %1648 = vmatpush3.bf16.msra.mxu0 %v1825_v42 }
 0x310   : > { %1649 = vmatprep.subr.bf16.mxu0 %v2216_v28 }
 0x313   : > { %1650 = vmatpush3.bf16.msra.mxu0 %v1826_v48 }
 0x314   : > { %1651 = vmatprep.subr.bf16.mxu0 %v2216_v28 }
 0x317   : > { %1652 = vmatpush3.bf16.msra.mxu0 %v1827_v49 }
 0x3cd   : > { %v894_v43 = vpop.f32.mrb[0].mxu0 }
 0x3ce   : > { %900 = vst [vmem:[%s610_s8] sm:$0xff] %v894_v43  ;;  %v901_v44 = vpack.c.bf16 %v894_v43, %v894_v43  ;;  %v1615_v45 = vpop.f32.mrb[1].mxu0 }
 0x3cf   : > { %v897_v46 = vpop.f32.mrb[2].mxu0 }
 0x3d0   : > { %v1616_v47 = vpop.f32.mrb[3].mxu0  ;;  %1634 = vmatmul.mubr.bf16.vlgmr.msra.gmra.mrb[0].mxu1 %v901_v44 }
 0x4a3   : > { %v1007_v51 = vpop.f32.mrb[0].mxu1 }
 0x4a4   : > { %v1008_v52 = vadd.f32 %v1513_v50, %v1007_v51  ;;  %v1635_v53 = vpop.f32.mrb[1].mxu1 }
 0x4a5   : > { %v1010_v54 = vpop.f32.mrb[2].mxu1 }
 0x4a6   : > { %v1013_v55 = vmax.f32 %v1008_v52, 0.0  ;;  %v1636_v56 = vpop.f32.mrb[3].mxu1 }
 0x4a8   : > { %v1014_v57 = vpack.c.bf16 %v1013_v55, %v1013_v55 }
 0x4aa   : > { %1654 = vmatmul.mubr.bf16.vlgmr.msra.gmra.mrb[4].mxu0 %v1014_v57 }
 0x57d   : > { %v1120_v59 = vpop.f32.mrb[4].mxu0 }
 0x57e   : > { %v1121_v60 = vadd.f32 %v1522_v58, %v1120_v59  ;;  %v1655_v61 = vpop.f32.mrb[5].mxu0 }
 0x57f   : > { %v1123_v62 = vpop.f32.mrb[6].mxu0 }
 0x580   : > { %1126 = vst [vmem:[%s617_s20] sm:$0xff] %v1121_v60  ;;  %v1656_v63 = vpop.f32.mrb[7].mxu0 }
 0x581 PF: > { %s3064_s23 = sld [smem:[#allocation60_spill]]  ;;  %s3066_s24 = sld [smem:[#allocation34_spill]] }
 0x582   : > { %s3067_s18 = sld [smem:[#allocation43_spill]]  ;;  %s1171_s2 = sshll.u32 %s610_s8, 4  ;;  %s2796_s2 = int_to_ptr.vmem [resolvable:$true] %s1171_s2 }
 0x583   : > { %s1133_s22 = scalar_lea.sflag [#allocation16], %s2652_s11  ;;  %s2006_s25 = scalar_lea.vmem %s2796_s2, 128 }
 0x584   : > { %p2007_p6 = scmp.ne.s32.totalorder %s2796_s2, %s2006_s25  ;;  %s2218_s28 = smov [#allocation15]  }
 0x585   : > { %s2010_s12 = sshll.u32 %s2218_s28, 4  ;;  %s2011_s12 = int_to_ptr.vmem [resolvable:$false] %s2010_s12 }
 0x586   : > { %s2012_s26 = scalar_lea.vmem %s2011_s12, 256  ;;  %p2013_p7 = scmp.lt.s32.totalorder %s2796_s2, %s2011_s12 }
 0x587   : > { %s3065_s1 = smov %s3064_s23  ;;  %s2792_s7 = scalar_lea.hbm %s3064_s23, %s2700_s4 }
 0x588   : > { %s1534_s10 = sshll.u32 %s3066_s24, 1  ;;  %p3068_p10 = scmp.ne.s32.totalorder %s3067_s18, 0 }
 0x589   : > { %p2014_p5 = scmp.lt.s32.totalorder %s2012_s26, %s2006_s25 }
 0x58a   : > { %p2008_p0 = pnand %p2007_p6, %p3068_p10 }
 0x58b   : > { %p2015_p9 = por %p2014_p5, %p2013_p7 }
 0x58c   : > { %p2009_p4 = pneg %p2008_p0 }
 0x58e   : > { %p2016_p12 = pnand %p2015_p9, %p2009_p4 }
 0x590   : > { %2019 = shalt.err (!%p2016_p12)
}
 0x591   : > { %s2020_s8 = scalar_lea.hbm %s2792_s7, 128  ;;  %s2024_s3 = scalar_lea.hbm %s3065_s1, 256 }
 0x592   : > { %p2021_p1 = scmp.ne.s32.totalorder %s2792_s7, %s2020_s8  ;;  %p2025_p2 = scmp.lt.u32.totalorder %s2792_s7, %s3065_s1 }
 0x593   : > { %p2026_p8 = scmp.lt.u32.totalorder %s2024_s3, %s2020_s8  ;;  %p2028_p6 = scmp.lt.u32.totalorder %s2020_s8, %s2792_s7 }
 0x594   : > { %p2022_p13 = pnand %p2021_p1, %p3068_p10 }
 0x595   : > { %p2027_p11 = por %p2026_p8, %p2025_p2 }
 0x596   : > { %p2023_p3 = pneg %p2022_p13 }
 0x597   : > { %p2029_p0 = por %p2028_p6, %p2027_p11 }
 0x599   : > { %p2030_p4 = pnand %p2029_p0, %p2023_p3 }
 0x59b   : > { %2033 = shalt.err (!%p2030_p4)
}
 0x59c   : > { %s3069_s9 = sld [smem:[#allocation35_spill]]  ;;  %s3070_s15 = sld [smem:[#allocation42_spill]] }
 0x59d   : > { %1673 = dma.vmem_to_hbm [thread:$0]  (%p3068_p10), %s2796_s2, 128, %s2792_s7, %s1133_s22  }
 0x59e   : > { %s1155_s17 = sshll.u32 %s2730_s30, 4  ;;  %s3071_s12 = sld [smem:[#allocation61_spill]]  ;;  %s2825_s17 = int_to_ptr.vmem [resolvable:$true] %s1155_s17 }
 0x59f   : > { %s3072_s13 = sld [smem:[#allocation59_spill]]  ;;  %s2842_s30 = sshll.u32 %s617_s20, 4  ;;  %s1185_s30 = int_to_ptr.vmem [resolvable:$true] %s2842_s30 }
 0x5a0   : > { %s1128_s7 = scalar_lea.sflag [#allocation7], %s2663_s27  ;;  %s2034_s24 = scalar_lea.vmem %s2825_s17, 128 }
 0x5a1   : > { %p2035_p7 = scmp.ne.s32.totalorder %s2825_s17, %s2034_s24  ;;  %s2219_s2 = smov [#allocation14]  }
 0x5a2   : > { %s1659_s0 = smul.u32 6, %s3069_s9  ;;  %p3073_p5 = scmp.ne.s32.totalorder %s3070_s15, 0 }
 0x5a4   : > { %s1152_s21 = sadd.s32 %s1659_s0, %s1534_s10  ;;  %s2833_s26 = scalar_lea.hbm %s3071_s12, %s2700_s4 }
 0x5a5   : > { %s1535_s23 = sshll.u32 %s1152_s21, 6  ;;  %p2036_p9 = pnand %p2035_p7, %p3073_p5 }
 0x5a6   : > { %s2838_s3 = scalar_lea.hbm %s3072_s13, %s1535_s23  ;;  %s2038_s10 = sshll.u32 %s2219_s2, 4  ;;  %s2039_s10 = int_to_ptr.vmem [resolvable:$false] %s2038_s10 }
 0x5a7   : > { %p2037_p12 = pneg %p2036_p9  ;;  %s2040_s19 = scalar_lea.vmem %s2039_s10, 256 }
 0x5a8   : > { %p2041_p1 = scmp.lt.s32.totalorder %s2825_s17, %s2039_s10  ;;  %p2042_p13 = scmp.lt.s32.totalorder %s2040_s19, %s2034_s24 }
 0x5aa   : > { %p2043_p3 = por %p2042_p13, %p2041_p1 }
 0x5ac   : > { %p2044_p2 = pnand %p2043_p3, %p2037_p12 }
 0x5ae   : > { %2047 = shalt.err (!%p2044_p2)
}
 0x5af   : > { %s2048_s16 = scalar_lea.hbm %s2838_s3, 128  ;;  %s2052_s29 = scalar_lea.hbm %s3072_s13, 768 }
 0x5b0   : > { %p2049_p8 = scmp.ne.s32.totalorder %s2838_s3, %s2048_s16  ;;  %p2053_p0 = scmp.lt.u32.totalorder %s2838_s3, %s3072_s13 }
 0x5b1   : > { %p2054_p4 = scmp.lt.u32.totalorder %s2052_s29, %s2048_s16  ;;  %p2056_p9 = scmp.lt.u32.totalorder %s2048_s16, %s2838_s3 }
 0x5b2   : > { %p2050_p11 = pnand %p2049_p8, %p3073_p5 }
 0x5b3   : > { %p2055_p7 = por %p2054_p4, %p2053_p0 }
 0x5b4   : > { %p2051_p6 = pneg %p2050_p11 }
 0x5b5   : > { %p2057_p12 = por %p2056_p9, %p2055_p7 }
 0x5b7   : > { %p2058_p1 = pnand %p2057_p12, %p2051_p6 }
 0x5b9   : > { %2061 = shalt.err (!%p2058_p1)
}
 0x5ba   : > { %s2220_s21 = smov 64   ;;  %s2221_s23 = smov 4  }
 0x5bb   : > { %1672 = dma.vmem_to_hbm [thread:$0]  (%p3073_p5), %s2825_s17, 128, %s2838_s3, %s1128_s7, %s2220_s21, %s2220_s21, %s2221_s23  }
 0x5bc   : > { %s2062_s25 = scalar_lea.vmem %s1185_s30, 128  ;;  %s2222_s28 = smov [#allocation17]  }
 0x5bd   : > { %p2063_p13 = scmp.ne.s32.totalorder %s1185_s30, %s2062_s25  ;;  %s2066_s8 = sshll.u32 %s2222_s28, 4  ;;  %s2067_s8 = int_to_ptr.vmem [resolvable:$false] %s2066_s8 }
 0x5be   : > { %s2068_s6 = scalar_lea.vmem %s2067_s8, 256  ;;  %p2069_p8 = scmp.lt.s32.totalorder %s1185_s30, %s2067_s8 }
 0x5bf   : > { %p2064_p3 = pnand %p2063_p13, %p3068_p10  ;;  %p2070_p11 = scmp.lt.s32.totalorder %s2068_s6, %s2062_s25 }
 0x5c1   : > { %p2065_p2 = pneg %p2064_p3  ;;  %p2071_p6 = por %p2070_p11, %p2069_p8 }
 0x5c3   : > { %p2072_p0 = pnand %p2071_p6, %p2065_p2 }
 0x5c5   : > { %2075 = shalt.err (!%p2072_p0)
}
 0x5c6   : > { %s2076_s27 = scalar_lea.hbm %s2833_s26, 128  ;;  %s2080_s3 = scalar_lea.hbm %s3071_s12, 256 }
 0x5c7   : > { %p2077_p5 = scmp.ne.s32.totalorder %s2833_s26, %s2076_s27  ;;  %p2081_p9 = scmp.lt.u32.totalorder %s2833_s26, %s3071_s12 }
 0x5c8   : > { %p2082_p12 = scmp.lt.u32.totalorder %s2080_s3, %s2076_s27  ;;  %p2084_p13 = scmp.lt.u32.totalorder %s2076_s27, %s2833_s26 }
 0x5c9   : > { %p2078_p4 = pnand %p2077_p5, %p3068_p10 }
 0x5ca   : > { %p2083_p1 = por %p2082_p12, %p2081_p9 }
 0x5cb   : > { %p2079_p7 = pneg %p2078_p4 }
 0x5cc   : > { %p2085_p3 = por %p2084_p13, %p2083_p1 }
 0x5ce   : > { %p2086_p2 = pnand %p2085_p3, %p2079_p7 }
 0x5d0   : > { %2089 = shalt.err (!%p2086_p2)
}
 0x5d1   : > { %1674 = dma.vmem_to_hbm [thread:$0]  (%p3068_p10), %s1185_s30, 128, %s2833_s26, %s1133_s22  }
 0x5d2 PF: > { %s3074_s2 = sld [smem:[#allocation38_spill]]  ;;  %s3075_s10 = sld [smem:[#allocation29_spill]] }
 0x5d3   : > { %s3076_s19 = sld [smem:[#allocation44_spill]] }
 0x5d8   : > { %p1705_p8 = scmp.ge.s32.totalorder %s3074_s2, 2  ;;  %s1196_s16 = sand.u32 1, %s3075_s10  }
 0x5d9   : > { %p3077_p11 = scmp.ne.s32.totalorder %s3076_s19, 0  ;;  %s1197_s4 = scalar_lea.sflag [#allocation7], %s1196_s16 }
 0x5db   : > { %p1695_p6 = pnand %p1705_p8, %p3077_p11 }
 0x5dd   : > { %2155 = dma.done.wait (!%p1695_p6), %s1197_s4, 128  }
 0x5de   : > { %2157 = vsyncadd (!%p1695_p6), %s1197_s4, 4294967168  ;;  %s3078_s20 = sadd.s32 4294967294, %s3074_s2   ;;  %s3079_s29 = sld [smem:[#allocation45_spill]] }
 0x5df   : > { %s1205_s9 = sand.u32 1, %s3078_s20  }
 0x5e0   : > { %s1206_s11 = scalar_lea.sflag [#allocation16], %s1205_s9 }
 0x5e4   : > { %p3080_p0 = scmp.ne.s32.totalorder %s3079_s29, 0 }
 0x5e6   : > { %p1698_p5 = pnand %p1705_p8, %p3080_p0 }
 0x5e8   : > { %2159 = dma.done.wait (!%p1698_p5), %s1206_s11, 256  }
 0x5e9   : > { %2161 = vsyncadd (!%p1698_p5), %s1206_s11, 4294967040  ;;  %s37_s27 = sadd.s32 1, %s3074_s2   ;;  %s3081_s17 = sld [smem:[#allocation30_spill]] }
 0x5ea   : > { %p34_p10 = scmp.ge.s32.totalorder %s37_s27, 8   ;;  %s3082_s18 = sld [smem:[#allocation31_spill]] }
 0x5eb   : > { %s3083_s19 = sld [smem:[#allocation49_spill]]  ;;  %s3084_s20 = sld [smem:[#allocation32_spill]] }
 0x5ec   : > { %s3085_s21 = sld [smem:[#allocation33_spill]]  ;;  %s3086_s22 = sld [smem:[#allocation48_spill]] }
 0x5ed   : > { %s3087_s23 = sld [smem:[#allocation36_spill]]  ;;  %s3088_s24 = sld [smem:[#allocation37_spill]] }
 0x5ee   : > { %s3089_s25 = sld [smem:[#allocation46_spill]]  ;;  %s3090_s26 = sld [smem:[#allocation47_spill]] }
 0x5ef   :  { %36 = sbr.rel (!%p34_p10) target bundleno = 28 (0x1c), region = 205 }
 0x5f6   :  { %1220 = vsyncpa [#allocation6], 1 }
 0x5f7   :  { %1222 = vsyncpa [#allocation6 + $0x1], 1 }
 0x5f8   :  { %1223 = vsyncpa [#allocation9], 1 }
 0x5f9   :  { %1225 = vsyncpa [#allocation9 + $0x1], 1 }
 0x5fa   :  { %1226 = vsyncpa [#allocation12], 1 }
 0x5fb   :  { %1228 = vsyncpa [#allocation12 + $0x1], 1 }
 0x5fc   :  { %1229 = vsyncpa [#allocation7], 1 }
 0x5fd   :  { %1231 = vsyncpa [#allocation7 + $0x1], 1 }
 0x5fe   :  { %1232 = vsyncpa [#allocation16], 1 }
 0x5ff   :  { %1234 = vsyncpa [#allocation16 + $0x1], 1 }
 0x600   :  { %1235 = vsyncmov [#allocation4] }
 0x603   :  { %s1236_s30 = vpop.sfrf %1235 }
 0x604   :  { %p1540_p4 = scmp.ne.s32.totalorder %s1236_s30, 0 }
 0x606   :  { %1240 = shalt.err (%p1540_p4)  }

</bundles_post_ra>
